<compile_context>
chip_gen: v7x
topology: tpu7x:2x2x1
jax: 0.10.0
libtpu: 0.0.40
codegen_flags: <defaults>
</compile_context>

<pallas_src>
import functools

import jax
import jax.numpy as jnp
from jax.experimental import pallas as pl
from jax.experimental.pallas import tpu as pltpu

C1, C2 = 10, 20          # conv output channels
KSIZE = 5                # conv kernel size
HID, NCLS = 50, 10       # fc hidden units / classes
NPAD = 128               # lane-dense padding for all output-channel dims


def _round_up(x, m):
    return (x + m - 1) // m * m


# ---------------------------------------------------------------------------
# Pallas kernels
# ---------------------------------------------------------------------------

def conv_pool_relu_kernel(p_ref, w_ref, b_ref, o_ref):
    """Fused conv (im2col matmul) + bias + 2x2 max-pool + ReLU.

    p_ref: (4, TM, K)  bf16 - 4 pooling-window slots of im2col patches
    w_ref: (K, NPAD)   bf16 - conv weight, out channels zero-padded to 128
    b_ref: (1, NPAD)   f32  - bias, zero-padded
    o_ref: (TM, NPAD)  bf16 - pooled + ReLU'd activations (lane-dense)
    """
    w = w_ref[...]
    acc = jnp.dot(p_ref[0], w, preferred_element_type=jnp.float32)
    for s in range(1, 4):                       # static unroll: max over window
        acc = jnp.maximum(
            acc, jnp.dot(p_ref[s], w, preferred_element_type=jnp.float32))
    o_ref[...] = jnp.maximum(acc + b_ref[...], 0.0).astype(o_ref.dtype)


def mlp_head_kernel(x_ref, w1_ref, b1_ref, w2_ref, b2_ref, o_ref, *,
                    num_classes):
    """out = log_softmax(relu(x @ W1 + b1) @ W2 + b2) over the real classes."""
    h = jnp.dot(x_ref[...], w1_ref[...], preferred_element_type=jnp.float32)
    h = jnp.maximum(h + b1_ref[...], 0.0)
    z = jnp.dot(h.astype(w2_ref.dtype), w2_ref[...],
                preferred_element_type=jnp.float32) + b2_ref[...]
    lane = jax.lax.broadcasted_iota(jnp.int32, z.shape, 1)
    z = jnp.where(lane < num_classes, z, -1e30)    # mask padded classes
    m = jnp.max(z, axis=-1, keepdims=True)
    lse = jnp.log(jnp.sum(jnp.exp(z - m), axis=-1, keepdims=True)) + m
    o_ref[...] = z - lse


# ---------------------------------------------------------------------------
# pallas_call wrappers (row-tiled "parallel" grids)
# ---------------------------------------------------------------------------

def conv_pool_relu(patches, w_pad, b_pad, *, tile_m=512):
    """patches: (4, M, K) bf16 -> (M, NPAD) bf16."""
    _, M, K = patches.shape
    npad = w_pad.shape[1]
    tile_m = min(tile_m, _round_up(M, 8))
    mp = _round_up(M, tile_m)
    if mp != M:
        patches = jnp.pad(patches, ((0, 0), (0, mp - M), (0, 0)))
    cost = pl.CostEstimate(
        flops=2 * 4 * mp * K * npad,
        transcendentals=0,
        bytes_accessed=(patches.size * 2 + w_pad.size * 2
                        + b_pad.size * 4 + mp * npad * 2))
    out = pl.pallas_call(
        conv_pool_relu_kernel,
        grid=(mp // tile_m,),
        in_specs=[
            pl.BlockSpec((4, tile_m, K), lambda i: (0, i, 0)),
            pl.BlockSpec((K, npad), lambda i: (0, 0)),     # resident weights
            pl.BlockSpec((1, npad), lambda i: (0, 0)),     # resident bias
        ],
        out_specs=pl.BlockSpec((tile_m, npad), lambda i: (i, 0)),
        out_shape=jax.ShapeDtypeStruct((mp, npad), jnp.bfloat16),
        compiler_params=pltpu.CompilerParams(
            dimension_semantics=("parallel",)),
        cost_estimate=cost,
    )(patches, w_pad, b_pad)
    return out[:M]


def mlp_head(flat, fw1, fb1, fw2, fb2, *, num_classes=NCLS, tile_b=512):
    """flat: (B, 320) bf16 -> (B, num_classes) f32 log-probs."""
    B, F = flat.shape
    npad = fw2.shape[1]
    tile_b = min(tile_b, _round_up(B, 8))
    bp = _round_up(B, tile_b)
    if bp != B:
        flat = jnp.pad(flat, ((0, bp - B), (0, 0)))
    kernel = functools.partial(mlp_head_kernel, num_classes=num_classes)
    cost = pl.CostEstimate(
        flops=2 * bp * (F * fw1.shape[1] + fw2.shape[0] * npad),
        transcendentals=bp * npad,
        bytes_accessed=(flat.size * 2 + fw1.size * 2 + fw2.size * 2
                        + (fb1.size + fb2.size) * 4 + bp * npad * 4))
    out = pl.pallas_call(
        kernel,
        grid=(bp // tile_b,),
        in_specs=[
            pl.BlockSpec((tile_b, F), lambda i: (i, 0)),
            pl.BlockSpec(fw1.shape, lambda i: (0, 0)),      # resident weights
            pl.BlockSpec((1, fb1.shape[1]), lambda i: (0, 0)),
            pl.BlockSpec(fw2.shape, lambda i: (0, 0)),
            pl.BlockSpec((1, fb2.shape[1]), lambda i: (0, 0)),
        ],
        out_specs=pl.BlockSpec((tile_b, npad), lambda i: (i, 0)),
        out_shape=jax.ShapeDtypeStruct((bp, npad), jnp.float32),
        compiler_params=pltpu.CompilerParams(
            dimension_semantics=("parallel",)),
        cost_estimate=cost,
    )(flat, fw1, fb1, fw2, fb2)
    return out[:B, :num_classes]


# ---------------------------------------------------------------------------
# Plain-JAX glue: pool-slot-grouped im2col (channels-last)
# ---------------------------------------------------------------------------

def pool_slot_patches(x_nhwc, k):
    """x: (B, H, W, C) -> patches (4, B*PH*PW, C*k*k).

    Slot axis = the 4 positions of each non-overlapping 2x2 pooling window
    of the conv output; patch features are ordered (c, kh, kw) to match the
    PyTorch Conv2d weight flattening.
    """
    B, H, W, C = x_nhwc.shape
    OH, OW = H - k + 1, W - k + 1
    PH, PW = OH // 2, OW // 2
    cols = [x_nhwc[:, kh:kh + OH, kw:kw + OW, :]
            for kh in range(k) for kw in range(k)]
    p = jnp.stack(cols, axis=-1)                  # (B, OH, OW, C, k*k)
    p = p.reshape(B, OH, OW, C * k * k)           # feature idx = c*k*k + kh*k + kw
    slots = [p[:, sy::2, sx::2, :].reshape(B * PH * PW, C * k * k)
             for sy in range(2) for sx in range(2)]
    return jnp.stack(slots, axis=0), (B, PH, PW)


# ---------------------------------------------------------------------------
# Full forward pass
# ---------------------------------------------------------------------------

def cnn_forward(x_nchw, kparams):
    """x: (B, 1, 28, 28) float32 (NCHW, like PyTorch). Returns (B, 10) log-probs."""
    (w1, b1), (w2, b2), (fw1, fb1), (fw2, fb2) = kparams

    # NCHW -> NHWC once (channels-last everywhere); bf16 matmul inputs.
    x = jnp.transpose(x_nchw, (0, 2, 3, 1)).astype(jnp.bfloat16)

    # conv1 (1->10, k=5) + maxpool2 + relu  — one fused kernel.
    p1, (B, ph1, pw1) = pool_slot_patches(x, KSIZE)        # (4, B*144, 25)
    a1 = conv_pool_relu(p1, w1, b1)                        # (B*144, 128) bf16
    a1 = a1.reshape(B, ph1, pw1, NPAD)[..., :C1]           # (B, 12, 12, 10)

    # conv2 (10->20, k=5) [+ Dropout2d eval = identity] + maxpool2 + relu.
    p2, (_, ph2, pw2) = pool_slot_patches(a1, KSIZE)       # (4, B*16, 250)
    a2 = conv_pool_relu(p2, w2, b2)                        # (B*16, 128) bf16
    a2 = a2.reshape(B, ph2, pw2, NPAD)[..., :C2]           # (B, 4, 4, 20)

    # Flatten in (h, w, c) order; fc1 weight rows were permuted to match.
    flat = a2.reshape(B, ph2 * pw2 * C2)                   # (B, 320) bf16

    # fc1 -> relu -> [dropout eval = identity] -> fc2 -> log_softmax.
    return mlp_head(flat, fw1, fb1, fw2, fb2)


# ---------------------------------------------------------------------------
# Parameters: PyTorch-layout init + one-time kernel-layout preparation
# ---------------------------------------------------------------------------

def init_params(key):
    """Deterministic synthetic parameters in PyTorch layout (CNN.__init__ shapes)."""
    ks = jax.random.split(key, 8)
    w1 = jax.random.normal(ks[0], (C1, 1, KSIZE, KSIZE), jnp.float32) * 0.1
    b1 = jax.random.normal(ks[1], (C1,), jnp.float32) * 0.1
    w2 = jax.random.normal(ks[2], (C2, C1, KSIZE, KSIZE), jnp.float32) * 0.05
    b2 = jax.random.normal(ks[3], (C2,), jnp.float32) * 0.05
    fw1 = jax.random.normal(ks[4], (HID, C2 * 4 * 4), jnp.float32) * 0.05
    fb1 = jax.random.normal(ks[5], (HID,), jnp.float32) * 0.05
    fw2 = jax.random.normal(ks[6], (NCLS, HID), jnp.float32) * 0.1
    fb2 = jax.random.normal(ks[7], (NCLS,), jnp.float32) * 0.1
    return (w1, b1), (w2, b2), (fw1, fb1), (fw2, fb2)


def prepare_params(params):
    """One-time conversion to kernel layout: (in, out) matmul weights, fc1 rows
    permuted (c,h,w)->(h,w,c), output dims zero-padded to 128 lanes, matmul
    weights cast to bf16, biases kept f32."""
    (w1, b1), (w2, b2), (fw1, fb1), (fw2, fb2) = params

    def pad_cols(a, n):
        return jnp.pad(a, ((0, 0), (0, n - a.shape[1])))

    w1m = pad_cols(w1.reshape(C1, -1).T, NPAD).astype(jnp.bfloat16)     # (25, 128)
    w2m = pad_cols(w2.reshape(C2, -1).T, NPAD).astype(jnp.bfloat16)     # (250, 128)
    b1m = jnp.pad(b1, (0, NPAD - C1)).reshape(1, NPAD).astype(jnp.float32)
    b2m = jnp.pad(b2, (0, NPAD - C2)).reshape(1, NPAD).astype(jnp.float32)

    # fc1: PyTorch input index = c*16 + h*4 + w ; kernel flatten is (h, w, c).
    f1 = fw1.reshape(HID, C2, 4, 4).transpose(0, 2, 3, 1).reshape(HID, -1)
    f1m = pad_cols(f1.T, NPAD).astype(jnp.bfloat16)                     # (320, 128)
    fb1m = jnp.pad(fb1, (0, NPAD - HID)).reshape(1, NPAD).astype(jnp.float32)

    f2m = jnp.pad(fw2.T, ((0, NPAD - HID), (0, NPAD - NCLS))).astype(jnp.bfloat16)
    fb2m = jnp.pad(fb2, (0, NPAD - NCLS)).reshape(1, NPAD).astype(jnp.float32)
    return (w1m, b1m), (w2m, b2m), (f1m, fb1m), (f2m, fb2m)


# ---------------------------------------------------------------------------
# Pure-JAX float32 reference (eval-mode PyTorch forward)
# ---------------------------------------------------------------------------

def cnn_reference(x_nchw, params):
    (w1, b1), (w2, b2), (fw1, fb1), (fw2, fb2) = params

    def conv(x, w, b):
        y = jax.lax.conv_general_dilated(
            x, w, (1, 1), "VALID",
            dimension_numbers=("NCHW", "OIHW", "NCHW"))
        return y + b[None, :, None, None]

    def maxpool2(y):
        B, C, H, W = y.shape
        return y.reshape(B, C, H // 2, 2, W // 2, 2).max(axis=(3, 5))

    y = jnp.maximum(maxpool2(conv(x_nchw, w1, b1)), 0.0)
    y = jnp.maximum(maxpool2(conv(y, w2, b2)), 0.0)
    flat = y.reshape(y.shape[0], -1)                  # PyTorch (C, H, W) order
    h = jnp.maximum(flat @ fw1.T + fb1, 0.0)
    z = h @ fw2.T + fb2
    return jax.nn.log_softmax(z, axis=-1)


if __name__ == "__main__":
    key = jax.random.PRNGKey(0)
    k_x, k_p = jax.random.split(key)

    # fc1 expects 320 = 20*4*4 features -> input spatial must be 28x28, 1 ch.
    B = 2
    x = jax.random.normal(k_x, (B, 1, 28, 28), jnp.float32)
    params = init_params(k_p)
    kparams = prepare_params(params)

    fwd = jax.jit(cnn_forward)
    out = jax.block_until_ready(fwd(x, kparams))

    assert out.shape == (B, NCLS), out.shape
    # log_softmax rows should exponentiate to probability distributions.
    row_sums = jnp.sum(jnp.exp(out), axis=1)
    assert bool(jnp.all(jnp.abs(row_sums - 1.0) < 1e-3)), row_sums

    # Compare against the pure-JAX f32 reference (bf16 matmul inputs -> loose tol).
    ref = cnn_reference(x, params)
    max_err = float(jnp.max(jnp.abs(out - ref)))
    assert max_err < 5e-2, f"max |pallas - reference| = {max_err}"

    print("KERNEL_OK")
</pallas_src>

<mosaic_0001>
module attributes {stable_mosaic.version = 11 : i64} {
  func.func @conv_pool_relu_kernel(%arg0: i32, %arg1: memref<4x288x25xbf16, #tpu.memory_space<vmem>>, %arg2: memref<25x128xbf16, #tpu.memory_space<vmem>>, %arg3: memref<1x128xf32, #tpu.memory_space<vmem>>, %arg4: memref<288x128xbf16, #tpu.memory_space<vmem>>) attributes {dimension_semantics = [#tpu.dimension_semantics<parallel>], iteration_bounds = array<i64: 1>, scalar_prefetch = 0 : i64, scratch_operands = 0 : i64, tpu.core_type = #tpu.core_type<tc>, window_params = [{transform_indices = @transform_0, window_bounds = array<i64: 4, 288, 25>}, {pipeline_mode = #tpu.pipeline_mode<synchronous>, transform_indices = @transform_1, window_bounds = array<i64: 25, 128>}, {pipeline_mode = #tpu.pipeline_mode<synchronous>, transform_indices = @transform_2, window_bounds = array<i64: 1, 128>}, {transform_indices = @transform_3, window_bounds = array<i64: 288, 128>}]} {
    %c0 = arith.constant 0 : index
    %c0_0 = arith.constant 0 : index
    %0 = vector.load %arg2[%c0, %c0_0] : memref<25x128xbf16, #tpu.memory_space<vmem>>, vector<25x128xbf16>
    %c0_1 = arith.constant 0 : index
    %c0_2 = arith.constant 0 : index
    %c0_3 = arith.constant 0 : index
    %1 = vector.load %arg1[%c0_1, %c0_2, %c0_3] : memref<4x288x25xbf16, #tpu.memory_space<vmem>>, vector<1x288x25xbf16>
    %2 = vector.shape_cast %1 : vector<1x288x25xbf16> to vector<288x25xbf16>
    %cst = arith.constant dense<0.000000e+00> : vector<288x128xf32>
    %3 = tpu.matmul %2, %0, %cst {dimension_numbers = #tpu.dot_dimension_numbers<[1], [0], [0], [1], [0, 0, 1, 1], [], []>} : vector<288x25xbf16>, vector<25x128xbf16>, vector<288x128xf32> -> vector<288x128xf32>
    %c1 = arith.constant 1 : index
    %c0_4 = arith.constant 0 : index
    %c0_5 = arith.constant 0 : index
    %4 = vector.load %arg1[%c1, %c0_4, %c0_5] : memref<4x288x25xbf16, #tpu.memory_space<vmem>>, vector<1x288x25xbf16>
    %5 = vector.shape_cast %4 : vector<1x288x25xbf16> to vector<288x25xbf16>
    %cst_6 = arith.constant dense<0.000000e+00> : vector<288x128xf32>
    %6 = tpu.matmul %5, %0, %cst_6 {dimension_numbers = #tpu.dot_dimension_numbers<[1], [0], [0], [1], [0, 0, 1, 1], [], []>} : vector<288x25xbf16>, vector<25x128xbf16>, vector<288x128xf32> -> vector<288x128xf32>
    %7 = arith.maximumf %3, %6 : vector<288x128xf32>
    %c2 = arith.constant 2 : index
    %c0_7 = arith.constant 0 : index
    %c0_8 = arith.constant 0 : index
    %8 = vector.load %arg1[%c2, %c0_7, %c0_8] : memref<4x288x25xbf16, #tpu.memory_space<vmem>>, vector<1x288x25xbf16>
    %9 = vector.shape_cast %8 : vector<1x288x25xbf16> to vector<288x25xbf16>
    %cst_9 = arith.constant dense<0.000000e+00> : vector<288x128xf32>
    %10 = tpu.matmul %9, %0, %cst_9 {dimension_numbers = #tpu.dot_dimension_numbers<[1], [0], [0], [1], [0, 0, 1, 1], [], []>} : vector<288x25xbf16>, vector<25x128xbf16>, vector<288x128xf32> -> vector<288x128xf32>
    %11 = arith.maximumf %7, %10 : vector<288x128xf32>
    %c3 = arith.constant 3 : index
    %c0_10 = arith.constant 0 : index
    %c0_11 = arith.constant 0 : index
    %12 = vector.load %arg1[%c3, %c0_10, %c0_11] : memref<4x288x25xbf16, #tpu.memory_space<vmem>>, vector<1x288x25xbf16>
    %13 = vector.shape_cast %12 : vector<1x288x25xbf16> to vector<288x25xbf16>
    %cst_12 = arith.constant dense<0.000000e+00> : vector<288x128xf32>
    %14 = tpu.matmul %13, %0, %cst_12 {dimension_numbers = #tpu.dot_dimension_numbers<[1], [0], [0], [1], [0, 0, 1, 1], [], []>} : vector<288x25xbf16>, vector<25x128xbf16>, vector<288x128xf32> -> vector<288x128xf32>
    %15 = arith.maximumf %11, %14 : vector<288x128xf32>
    %c0_13 = arith.constant 0 : index
    %c0_14 = arith.constant 0 : index
    %16 = vector.load %arg3[%c0_13, %c0_14] : memref<1x128xf32, #tpu.memory_space<vmem>>, vector<1x128xf32>
    %17 = vector.broadcast %16 : vector<1x128xf32> to vector<288x128xf32>
    %18 = arith.addf %15, %17 : vector<288x128xf32>
    %cst_15 = arith.constant 0.000000e+00 : f32
    %19 = vector.broadcast %cst_15 : f32 to vector<288x128xf32>
    %20 = arith.maximumf %18, %19 : vector<288x128xf32>
    %21 = arith.truncf %20 : vector<288x128xf32> to vector<288x128xbf16>
    %c0_16 = arith.constant 0 : index
    %c0_17 = arith.constant 0 : index
    %22 = vector.load %arg4[%c0_16, %c0_17] : memref<288x128xbf16, #tpu.memory_space<vmem>>, vector<288x128xbf16>
    tpu.vector_store %arg4[%c0_16, %c0_17], %21 {strides = array<i32>} : memref<288x128xbf16, #tpu.memory_space<vmem>>, vector<288x128xbf16>,
    return
  }
  func.func @transform_0(%arg0: i32) -> (i32, i32, i32) {
    %c0_i32 = arith.constant 0 : i32
    %c0_i32_0 = arith.constant 0 : i32
    %c0_i32_1 = arith.constant 0 : i32
    return %c0_i32, %arg0, %c0_i32_0 : i32, i32, i32
  }
  func.func @transform_1(%arg0: i32) -> (i32, i32) {
    %c0_i32 = arith.constant 0 : i32
    %c0_i32_0 = arith.constant 0 : i32
    %c0_i32_1 = arith.constant 0 : i32
    return %c0_i32, %c0_i32_0 : i32, i32
  }
  func.func @transform_2(%arg0: i32) -> (i32, i32) {
    %c0_i32 = arith.constant 0 : i32
    %c0_i32_0 = arith.constant 0 : i32
    %c0_i32_1 = arith.constant 0 : i32
    return %c0_i32, %c0_i32_0 : i32, i32
  }
  func.func @transform_3(%arg0: i32) -> (i32, i32) {
    %c0_i32 = arith.constant 0 : i32
    %c0_i32_0 = arith.constant 0 : i32
    return %arg0, %c0_i32 : i32, i32
  }
}

module attributes {stable_mosaic.version = 11 : i64} {
  func.func @mlp_head_kernel(%arg0: i32, %arg1: memref<8x320xbf16, #tpu.memory_space<vmem>>, %arg2: memref<320x128xbf16, #tpu.memory_space<vmem>>, %arg3: memref<1x128xf32, #tpu.memory_space<vmem>>, %arg4: memref<128x128xbf16, #tpu.memory_space<vmem>>, %arg5: memref<1x128xf32, #tpu.memory_space<vmem>>, %arg6: memref<8x128xf32, #tpu.memory_space<vmem>>) attributes {dimension_semantics = [#tpu.dimension_semantics<parallel>], iteration_bounds = array<i64: 1>, scalar_prefetch = 0 : i64, scratch_operands = 0 : i64, tpu.core_type = #tpu.core_type<tc>, window_params = [{transform_indices = @transform_0, window_bounds = array<i64: 8, 320>}, {pipeline_mode = #tpu.pipeline_mode<synchronous>, transform_indices = @transform_1, window_bounds = array<i64: 320, 128>}, {pipeline_mode = #tpu.pipeline_mode<synchronous>, transform_indices = @transform_2, window_bounds = array<i64: 1, 128>}, {pipeline_mode = #tpu.pipeline_mode<synchronous>, transform_indices = @transform_3, window_bounds = array<i64: 128, 128>}, {pipeline_mode = #tpu.pipeline_mode<synchronous>, transform_indices = @transform_4, window_bounds = array<i64: 1, 128>}, {transform_indices = @transform_5, window_bounds = array<i64: 8, 128>}]} {
    %c0 = arith.constant 0 : index
    %c0_0 = arith.constant 0 : index
    %0 = vector.load %arg1[%c0, %c0_0] : memref<8x320xbf16, #tpu.memory_space<vmem>>, vector<8x320xbf16>
    %c0_1 = arith.constant 0 : index
    %c0_2 = arith.constant 0 : index
    %1 = vector.load %arg2[%c0_1, %c0_2] : memref<320x128xbf16, #tpu.memory_space<vmem>>, vector<320x128xbf16>
    %cst = arith.constant dense<0.000000e+00> : vector<8x128xf32>
    %2 = tpu.matmul %0, %1, %cst {dimension_numbers = #tpu.dot_dimension_numbers<[1], [0], [0], [1], [0, 0, 1, 1], [], []>} : vector<8x320xbf16>, vector<320x128xbf16>, vector<8x128xf32> -> vector<8x128xf32>
    %c0_3 = arith.constant 0 : index
    %c0_4 = arith.constant 0 : index
    %3 = vector.load %arg3[%c0_3, %c0_4] : memref<1x128xf32, #tpu.memory_space<vmem>>, vector<1x128xf32>
    %4 = vector.broadcast %3 : vector<1x128xf32> to vector<8x128xf32>
    %5 = arith.addf %2, %4 : vector<8x128xf32>
    %cst_5 = arith.constant 0.000000e+00 : f32
    %6 = vector.broadcast %cst_5 : f32 to vector<8x128xf32>
    %7 = arith.maximumf %5, %6 : vector<8x128xf32>
    %8 = arith.truncf %7 : vector<8x128xf32> to vector<8x128xbf16>
    %c0_6 = arith.constant 0 : index
    %c0_7 = arith.constant 0 : index
    %9 = vector.load %arg4[%c0_6, %c0_7] : memref<128x128xbf16, #tpu.memory_space<vmem>>, vector<128x128xbf16>
    %cst_8 = arith.constant dense<0.000000e+00> : vector<8x128xf32>
    %10 = tpu.matmul %8, %9, %cst_8 {dimension_numbers = #tpu.dot_dimension_numbers<[1], [0], [0], [1], [0, 0, 1, 1], [], []>} : vector<8x128xbf16>, vector<128x128xbf16>, vector<8x128xf32> -> vector<8x128xf32>
    %c0_9 = arith.constant 0 : index
    %c0_10 = arith.constant 0 : index
    %11 = vector.load %arg5[%c0_9, %c0_10] : memref<1x128xf32, #tpu.memory_space<vmem>>, vector<1x128xf32>
    %12 = vector.broadcast %11 : vector<1x128xf32> to vector<8x128xf32>
    %13 = arith.addf %10, %12 : vector<8x128xf32>
    %14 = tpu.iota {dimensions = array<i32: 1>} : vector<8x128xi32>
    %c10_i32 = arith.constant 10 : i32
    %15 = vector.broadcast %c10_i32 : i32 to vector<8x128xi32>
    %16 = arith.cmpi slt, %14, %15 : vector<8x128xi32>
    %cst_11 = arith.constant -1.000000e+30 : f32
    %17 = vector.broadcast %cst_11 : f32 to vector<8x128xf32>
    %18 = arith.select %16, %13, %17 : vector<8x128xi1>, vector<8x128xf32>
    %cst_12 = arith.constant dense<0xFF800000> : vector<8xf32>
    %19 = vector.multi_reduction <maximumf>, %18, %cst_12 [1] : vector<8x128xf32> to vector<8xf32>
    %20 = vector.shape_cast %19 : vector<8xf32> to vector<8x1xf32>
    %21 = vector.broadcast %20 : vector<8x1xf32> to vector<8x128xf32>
    %22 = arith.subf %18, %21 : vector<8x128xf32>
    %23 = math.exp %22 : vector<8x128xf32>
    %cst_13 = arith.constant dense<0.000000e+00> : vector<8xf32>
    %24 = vector.multi_reduction <add>, %23, %cst_13 [1] : vector<8x128xf32> to vector<8xf32>
    %25 = vector.shape_cast %24 : vector<8xf32> to vector<8x1xf32>
    %26 = math.log %25 : vector<8x1xf32>
    %27 = arith.addf %26, %20 : vector<8x1xf32>
    %28 = vector.broadcast %27 : vector<8x1xf32> to vector<8x128xf32>
    %29 = arith.subf %18, %28 : vector<8x128xf32>
    %c0_14 = arith.constant 0 : index
    %c0_15 = arith.constant 0 : index
    %30 = vector.load %arg6[%c0_14, %c0_15] : memref<8x128xf32, #tpu.memory_space<vmem>>, vector<8x128xf32>
    tpu.vector_store %arg6[%c0_14, %c0_15], %29 {strides = array<i32>} : memref<8x128xf32, #tpu.memory_space<vmem>>, vector<8x128xf32>,
    return
  }
  func.func @transform_0(%arg0: i32) -> (i32, i32) {
    %c0_i32 = arith.constant 0 : i32
    %c0_i32_0 = arith.constant 0 : i32
    return %arg0, %c0_i32 : i32, i32
  }
  func.func @transform_1(%arg0: i32) -> (i32, i32) {
    %c0_i32 = arith.constant 0 : i32
    %c0_i32_0 = arith.constant 0 : i32
    %c0_i32_1 = arith.constant 0 : i32
    return %c0_i32, %c0_i32_0 : i32, i32
  }
  func.func @transform_2(%arg0: i32) -> (i32, i32) {
    %c0_i32 = arith.constant 0 : i32
    %c0_i32_0 = arith.constant 0 : i32
    %c0_i32_1 = arith.constant 0 : i32
    return %c0_i32, %c0_i32_0 : i32, i32
  }
  func.func @transform_3(%arg0: i32) -> (i32, i32) {
    %c0_i32 = arith.constant 0 : i32
    %c0_i32_0 = arith.constant 0 : i32
    %c0_i32_1 = arith.constant 0 : i32
    return %c0_i32, %c0_i32_0 : i32, i32
  }
  func.func @transform_4(%arg0: i32) -> (i32, i32) {
    %c0_i32 = arith.constant 0 : i32
    %c0_i32_0 = arith.constant 0 : i32
    %c0_i32_1 = arith.constant 0 : i32
    return %c0_i32, %c0_i32_0 : i32, i32
  }
  func.func @transform_5(%arg0: i32) -> (i32, i32) {
    %c0_i32 = arith.constant 0 : i32
    %c0_i32_0 = arith.constant 0 : i32
    return %arg0, %c0_i32 : i32, i32
  }
}

module attributes {stable_mosaic.version = 11 : i64} {
  func.func @conv_pool_relu_kernel(%arg0: i32, %arg1: memref<4x32x250xbf16, #tpu.memory_space<vmem>>, %arg2: memref<250x128xbf16, #tpu.memory_space<vmem>>, %arg3: memref<1x128xf32, #tpu.memory_space<vmem>>, %arg4: memref<32x128xbf16, #tpu.memory_space<vmem>>) attributes {dimension_semantics = [#tpu.dimension_semantics<parallel>], iteration_bounds = array<i64: 1>, scalar_prefetch = 0 : i64, scratch_operands = 0 : i64, tpu.core_type = #tpu.core_type<tc>, window_params = [{transform_indices = @transform_0, window_bounds = array<i64: 4, 32, 250>}, {pipeline_mode = #tpu.pipeline_mode<synchronous>, transform_indices = @transform_1, window_bounds = array<i64: 250, 128>}, {pipeline_mode = #tpu.pipeline_mode<synchronous>, transform_indices = @transform_2, window_bounds = array<i64: 1, 128>}, {transform_indices = @transform_3, window_bounds = array<i64: 32, 128>}]} {
    %c0 = arith.constant 0 : index
    %c0_0 = arith.constant 0 : index
    %0 = vector.load %arg2[%c0, %c0_0] : memref<250x128xbf16, #tpu.memory_space<vmem>>, vector<250x128xbf16>
    %c0_1 = arith.constant 0 : index
    %c0_2 = arith.constant 0 : index
    %c0_3 = arith.constant 0 : index
    %1 = vector.load %arg1[%c0_1, %c0_2, %c0_3] : memref<4x32x250xbf16, #tpu.memory_space<vmem>>, vector<1x32x250xbf16>
    %2 = vector.shape_cast %1 : vector<1x32x250xbf16> to vector<32x250xbf16>
    %cst = arith.constant dense<0.000000e+00> : vector<32x128xf32>
    %3 = tpu.matmul %2, %0, %cst {dimension_numbers = #tpu.dot_dimension_numbers<[1], [0], [0], [1], [0, 0, 1, 1], [], []>} : vector<32x250xbf16>, vector<250x128xbf16>, vector<32x128xf32> -> vector<32x128xf32>
    %c1 = arith.constant 1 : index
    %c0_4 = arith.constant 0 : index
    %c0_5 = arith.constant 0 : index
    %4 = vector.load %arg1[%c1, %c0_4, %c0_5] : memref<4x32x250xbf16, #tpu.memory_space<vmem>>, vector<1x32x250xbf16>
    %5 = vector.shape_cast %4 : vector<1x32x250xbf16> to vector<32x250xbf16>
    %cst_6 = arith.constant dense<0.000000e+00> : vector<32x128xf32>
    %6 = tpu.matmul %5, %0, %cst_6 {dimension_numbers = #tpu.dot_dimension_numbers<[1], [0], [0], [1], [0, 0, 1, 1], [], []>} : vector<32x250xbf16>, vector<250x128xbf16>, vector<32x128xf32> -> vector<32x128xf32>
    %7 = arith.maximumf %3, %6 : vector<32x128xf32>
    %c2 = arith.constant 2 : index
    %c0_7 = arith.constant 0 : index
    %c0_8 = arith.constant 0 : index
    %8 = vector.load %arg1[%c2, %c0_7, %c0_8] : memref<4x32x250xbf16, #tpu.memory_space<vmem>>, vector<1x32x250xbf16>
    %9 = vector.shape_cast %8 : vector<1x32x250xbf16> to vector<32x250xbf16>
    %cst_9 = arith.constant dense<0.000000e+00> : vector<32x128xf32>
    %10 = tpu.matmul %9, %0, %cst_9 {dimension_numbers = #tpu.dot_dimension_numbers<[1], [0], [0], [1], [0, 0, 1, 1], [], []>} : vector<32x250xbf16>, vector<250x128xbf16>, vector<32x128xf32> -> vector<32x128xf32>
    %11 = arith.maximumf %7, %10 : vector<32x128xf32>
    %c3 = arith.constant 3 : index
    %c0_10 = arith.constant 0 : index
    %c0_11 = arith.constant 0 : index
    %12 = vector.load %arg1[%c3, %c0_10, %c0_11] : memref<4x32x250xbf16, #tpu.memory_space<vmem>>, vector<1x32x250xbf16>
    %13 = vector.shape_cast %12 : vector<1x32x250xbf16> to vector<32x250xbf16>
    %cst_12 = arith.constant dense<0.000000e+00> : vector<32x128xf32>
    %14 = tpu.matmul %13, %0, %cst_12 {dimension_numbers = #tpu.dot_dimension_numbers<[1], [0], [0], [1], [0, 0, 1, 1], [], []>} : vector<32x250xbf16>, vector<250x128xbf16>, vector<32x128xf32> -> vector<32x128xf32>
    %15 = arith.maximumf %11, %14 : vector<32x128xf32>
    %c0_13 = arith.constant 0 : index
    %c0_14 = arith.constant 0 : index
    %16 = vector.load %arg3[%c0_13, %c0_14] : memref<1x128xf32, #tpu.memory_space<vmem>>, vector<1x128xf32>
    %17 = vector.broadcast %16 : vector<1x128xf32> to vector<32x128xf32>
    %18 = arith.addf %15, %17 : vector<32x128xf32>
    %cst_15 = arith.constant 0.000000e+00 : f32
    %19 = vector.broadcast %cst_15 : f32 to vector<32x128xf32>
    %20 = arith.maximumf %18, %19 : vector<32x128xf32>
    %21 = arith.truncf %20 : vector<32x128xf32> to vector<32x128xbf16>
    %c0_16 = arith.constant 0 : index
    %c0_17 = arith.constant 0 : index
    %22 = vector.load %arg4[%c0_16, %c0_17] : memref<32x128xbf16, #tpu.memory_space<vmem>>, vector<32x128xbf16>
    tpu.vector_store %arg4[%c0_16, %c0_17], %21 {strides = array<i32>} : memref<32x128xbf16, #tpu.memory_space<vmem>>, vector<32x128xbf16>,
    return
  }
  func.func @transform_0(%arg0: i32) -> (i32, i32, i32) {
    %c0_i32 = arith.constant 0 : i32
    %c0_i32_0 = arith.constant 0 : i32
    %c0_i32_1 = arith.constant 0 : i32
    return %c0_i32, %arg0, %c0_i32_0 : i32, i32, i32
  }
  func.func @transform_1(%arg0: i32) -> (i32, i32) {
    %c0_i32 = arith.constant 0 : i32
    %c0_i32_0 = arith.constant 0 : i32
    %c0_i32_1 = arith.constant 0 : i32
    return %c0_i32, %c0_i32_0 : i32, i32
  }
  func.func @transform_2(%arg0: i32) -> (i32, i32) {
    %c0_i32 = arith.constant 0 : i32
    %c0_i32_0 = arith.constant 0 : i32
    %c0_i32_1 = arith.constant 0 : i32
    return %c0_i32, %c0_i32_0 : i32, i32
  }
  func.func @transform_3(%arg0: i32) -> (i32, i32) {
    %c0_i32 = arith.constant 0 : i32
    %c0_i32_0 = arith.constant 0 : i32
    return %arg0, %c0_i32 : i32, i32
  }
}

</mosaic_0001>

<bundles_post_ra>
// kernel: cnn_forward.3
= control target key start
LH: loop header
LB: loop body
LE: loop exit
PB: predicated region body
PF: predicated region fallthrough
CT: control target
= control target key end

     0   :  { %vm211_vm0 = vcmask 1043456   ;;  %vm212_vm1 = vcmask 1044480   ;;  %vm156_vm2 = vcmask 203776   ;;  %v2589_v1 = vmov 65535   ;;  %s3323_s1 = inlined_call_operand.vmem [shape: bf16[25,128], index: 1, kind: input, shape index: {}]   ;;  %s3324_s0 = inlined_call_operand.vmem [shape: bf16[4,288,25], index: 0, kind: input, shape index: {}]   ;;  %s3325_s2 = inlined_call_operand.vmem [shape: f32[1,128], index: 2, kind: input, shape index: {}]   ;;  %s3326_s3 = inlined_call_operand.vmem [shape: bf16[288,128], index: 3, kind: output, shape index: {}]  }
   0x1   :  { %v2515_v0 = vld [vmem:[%s3323_s1] sm:$0xff]   ;;  %v213_v2 = vsel %vm211_vm0, 4294967295, %v2589_v1  ;;  %v2516_v3 = vld [vmem:[%s3323_s1 + $0x8] sm:$0x1f]   ;;  %v2518_v7 = vld [vmem:[%s3324_s0 + $0x90] sm:$0xff]  }
   0x2   :  { %2354 = vmatprep.subr.bf16.mxu0 %v2515_v0  ;;  %2394 = vmatprep.subr.bf16.mxu1 %v2515_v0  ;;  %v214_v4 = vsel %vm212_vm1, %v213_v2, 0  ;;  %v2517_v5 = vld [vmem:[%s3324_s0] sm:$0xff]   ;;  %v2519_v8 = vld [vmem:[%s3324_s0 + $0x8] sm:$0xff]   ;;  %v2520_v9 = vld [vmem:[%s3324_s0 + $0x98] sm:$0xff]  }
   0x3   :  { %2355 = vmatpush3.bf16.msra.mxu0 %v2515_v0  ;;  %2395 = vmatpush3.bf16.msra.mxu1 %v2515_v0  ;;  %v216_v6 = vand.u32 %v2516_v3, %v214_v4  ;;  %v2521_v10 = vld [vmem:[%s3324_s0 + $0x10] sm:$0xff]   ;;  %v2522_v11 = vld [vmem:[%s3324_s0 + $0xa0] sm:$0xff]   ;;  %v2523_v12 = vld [vmem:[%s3324_s0 + $0x18] sm:$0xff]  }
   0x4   :  { %2358 = vmatprep.mubr.msk.bf16.mxu0 %vm156_vm2, %v2517_v5  ;;  %2398 = vmatprep.mubr.msk.bf16.mxu1 %vm156_vm2, %v2518_v7  ;;  %v2524_v13 = vld [vmem:[%s3324_s0 + $0xa8] sm:$0xff]   ;;  %v2525_v14 = vld [vmem:[%s3324_s0 + $0x20] sm:$0xff]   ;;  %v2526_v15 = vld [vmem:[%s3324_s0 + $0xb0] sm:$0xff]  }
   0x5   :  { %2356 = vmatprep.subr.bf16.mxu0 %v216_v6  ;;  %2396 = vmatprep.subr.bf16.mxu1 %v216_v6  ;;  %v2527_v16 = vld [vmem:[%s3324_s0 + $0x28] sm:$0xff]   ;;  %v2528_v17 = vld [vmem:[%s3324_s0 + $0xb8] sm:$0xff]   ;;  %v2529_v18 = vld [vmem:[%s3324_s0 + $0x30] sm:$0xff]  }
   0x6   :  { %v2530_v19 = vld [vmem:[%s3324_s0 + $0xc0] sm:$0xff]   ;;  %v2531_v20 = vld [vmem:[%s3324_s0 + $0x38] sm:$0xff]   ;;  %v2532_v21 = vld [vmem:[%s3324_s0 + $0xc8] sm:$0xff]  }
   0x7   :  { %2357 = vmatpush3.bf16.msra.mxu0 %v216_v6  ;;  %2397 = vmatpush3.bf16.msra.mxu1 %v216_v6  ;;  %v2533_v22 = vld [vmem:[%s3324_s0 + $0x40] sm:$0xff]   ;;  %v2534_v23 = vld [vmem:[%s3324_s0 + $0xd0] sm:$0xff]   ;;  %v2535_v24 = vld [vmem:[%s3324_s0 + $0x48] sm:$0xff]  }
   0x8   :  { %2434 = vmatprep.subr.bf16.mxu0 %v2515_v0  ;;  %2474 = vmatprep.subr.bf16.mxu1 %v2515_v0  ;;  %v2536_v25 = vld [vmem:[%s3324_s0 + $0xd8] sm:$0xff]   ;;  %v2537_v26 = vld [vmem:[%s3324_s0 + $0x50] sm:$0xff]   ;;  %v2538_v27 = vld [vmem:[%s3324_s0 + $0xe0] sm:$0xff]  }
   0x9   :  { %v2539_v28 = vld [vmem:[%s3324_s0 + $0x58] sm:$0xff]   ;;  %v2540_v29 = vld [vmem:[%s3324_s0 + $0xe8] sm:$0xff]   ;;  %v2541_v30 = vld [vmem:[%s3324_s0 + $0x60] sm:$0xff]  }
   0xa   :  { %2359 = vmatmul.mubr.msk.bf16.vlgmr.msra.gmra.mrb[0].mxu0 %vm156_vm2, %v2519_v8  ;;  %2399 = vmatmul.mubr.msk.bf16.vlgmr.msra.gmra.mrb[0].mxu1 %vm156_vm2, %v2520_v9  ;;  %v2542_v31 = vld [vmem:[%s3324_s0 + $0xf0] sm:$0xff]   ;;  %v2543_v32 = vld [vmem:[%s3324_s0 + $0x68] sm:$0xff]   ;;  %v2544_v33 = vld [vmem:[%s3324_s0 + $0xf8] sm:$0xff]  }
   0xb   :  { %2435 = vmatpush3.bf16.msra.mxu0 %v2515_v0  ;;  %2475 = vmatpush3.bf16.msra.mxu1 %v2515_v0  ;;  %v2545_v34 = vld [vmem:[%s3324_s0 + $0x70] sm:$0xff]   ;;  %v2546_v35 = vld [vmem:[%s3324_s0 + $0x100] sm:$0xff]   ;;  %v2547_v36 = vld [vmem:[%s3324_s0 + $0x78] sm:$0xff]  }
   0xc   :  { %2362 = vmatprep.mubr.msk.bf16.mxu0 %vm156_vm2, %v2521_v10  ;;  %2402 = vmatprep.mubr.msk.bf16.mxu1 %vm156_vm2, %v2522_v11  ;;  %v2548_v37 = vld [vmem:[%s3324_s0 + $0x108] sm:$0xff]   ;;  %v2549_v38 = vld [vmem:[%s3324_s0 + $0x80] sm:$0xff]   ;;  %v2550_v39 = vld [vmem:[%s3324_s0 + $0x110] sm:$0xff]  }
   0xd   :  { %2436 = vmatprep.subr.bf16.mxu0 %v216_v6  ;;  %2476 = vmatprep.subr.bf16.mxu1 %v216_v6  ;;  %v2551_v40 = vld [vmem:[%s3324_s0 + $0x88] sm:$0xff]   ;;  %v2552_v41 = vld [vmem:[%s3324_s0 + $0x118] sm:$0xff]   ;;  %v2553_v42 = vld [vmem:[%s3324_s0 + $0x120] sm:$0xff]  }
   0xe   :  { %v2554_v43 = vld [vmem:[%s3324_s0 + $0x1b0] sm:$0xff]   ;;  %v2555_v44 = vld [vmem:[%s3324_s0 + $0x128] sm:$0xff]   ;;  %v2556_v45 = vld [vmem:[%s3324_s0 + $0x1b8] sm:$0xff]  }
   0xf   :  { %2437 = vmatpush3.bf16.msra.mxu0 %v216_v6  ;;  %2477 = vmatpush3.bf16.msra.mxu1 %v216_v6  ;;  %v2557_v46 = vld [vmem:[%s3324_s0 + $0x130] sm:$0xff]   ;;  %v2558_v47 = vld [vmem:[%s3324_s0 + $0x1c0] sm:$0xff]   ;;  %v2559_v48 = vld [vmem:[%s3324_s0 + $0x138] sm:$0xff]  }
  0x10   :  { %v2560_v49 = vld [vmem:[%s3324_s0 + $0x1c8] sm:$0xff]   ;;  %v2561_v50 = vld [vmem:[%s3324_s0 + $0x140] sm:$0xff]   ;;  %v2562_v51 = vld [vmem:[%s3324_s0 + $0x1d0] sm:$0xff]  }
  0x11   :  { %v2563_v52 = vld [vmem:[%s3324_s0 + $0x148] sm:$0xff]   ;;  %v2564_v53 = vld [vmem:[%s3324_s0 + $0x1d8] sm:$0xff]   ;;  %v2565_v54 = vld [vmem:[%s3324_s0 + $0x150] sm:$0xff]  }
  0x12   :  { %2363 = vmatmul.mubr.msk.bf16.gmra.mrb[4].mxu0 %vm156_vm2, %v2523_v12  ;;  %2403 = vmatmul.mubr.msk.bf16.gmra.mrb[4].mxu1 %vm156_vm2, %v2524_v13  ;;  %v2566_v55 = vld [vmem:[%s3324_s0 + $0x1e0] sm:$0xff]   ;;  %v2567_v56 = vld [vmem:[%s3324_s0 + $0x158] sm:$0xff]   ;;  %v2568_v57 = vld [vmem:[%s3324_s0 + $0x1e8] sm:$0xff]  }
  0x13   :  { %2366 = vmatprep.mubr.msk.bf16.mxu0 %vm156_vm2, %v2525_v14  ;;  %2406 = vmatprep.mubr.msk.bf16.mxu1 %vm156_vm2, %v2526_v15  ;;  %v2569_v58 = vld [vmem:[%s3324_s0 + $0x160] sm:$0xff]   ;;  %v2570_v59 = vld [vmem:[%s3324_s0 + $0x1f0] sm:$0xff]   ;;  %v2571_v60 = vld [vmem:[%s3324_s0 + $0x168] sm:$0xff]  }
  0x14   :  { %v2572_v61 = vld [vmem:[%s3324_s0 + $0x1f8] sm:$0xff]   ;;  %v2573_v62 = vld [vmem:[%s3324_s0 + $0x170] sm:$0xff]   ;;  %v2574_v63 = vld [vmem:[%s3324_s0 + $0x200] sm:$0xff]  }
  0x15   :  { %v2575_v0 = vld [vmem:[%s3324_s0 + $0x178] sm:$0xff]   ;;  %v2576_v1 = vld [vmem:[%s3324_s0 + $0x208] sm:$0xff]   ;;  %v2577_v2 = vld [vmem:[%s3324_s0 + $0x180] sm:$0xff]  }
  0x16   :  { %v2578_v3 = vld [vmem:[%s3324_s0 + $0x210] sm:$0xff]   ;;  %v2579_v4 = vld [vmem:[%s3324_s0 + $0x188] sm:$0xff]   ;;  %v2580_v5 = vld [vmem:[%s3324_s0 + $0x218] sm:$0xff]  }
  0x17   :  { %v2581_v6 = vld [vmem:[%s3324_s0 + $0x190] sm:$0xff]   ;;  %v2582_v7 = vld [vmem:[%s3324_s0 + $0x220] sm:$0xff]   ;;  %v2583_v8 = vld [vmem:[%s3324_s0 + $0x198] sm:$0xff]  }
  0x18   :  { %v2584_v9 = vld [vmem:[%s3324_s0 + $0x228] sm:$0xff]   ;;  %v2585_v10 = vld [vmem:[%s3324_s0 + $0x1a0] sm:$0xff]   ;;  %v2586_v11 = vld [vmem:[%s3324_s0 + $0x230] sm:$0xff]  }
  0x19   :  { %v2587_v12 = vld [vmem:[%s3324_s0 + $0x1a8] sm:$0xff]   ;;  %v2588_v13 = vld [vmem:[%s3324_s0 + $0x238] sm:$0xff]  }
  0x1a   :  { %2367 = vmatmul.mubr.msk.bf16.gmra.mrb[8].mxu0 %vm156_vm2, %v2527_v16  ;;  %2407 = vmatmul.mubr.msk.bf16.gmra.mrb[8].mxu1 %vm156_vm2, %v2528_v17 }
  0x1b   :  { %2370 = vmatprep.mubr.msk.bf16.mxu0 %vm156_vm2, %v2529_v18  ;;  %2410 = vmatprep.mubr.msk.bf16.mxu1 %vm156_vm2, %v2530_v19 }
  0x22   :  { %2371 = vmatmul.mubr.msk.bf16.gmra.mrb[12].mxu0 %vm156_vm2, %v2531_v20  ;;  %2411 = vmatmul.mubr.msk.bf16.gmra.mrb[12].mxu1 %vm156_vm2, %v2532_v21 }
  0x23   :  { %2374 = vmatprep.mubr.msk.bf16.mxu0 %vm156_vm2, %v2533_v22  ;;  %2414 = vmatprep.mubr.msk.bf16.mxu1 %vm156_vm2, %v2534_v23 }
  0x2a   :  { %2375 = vmatmul.mubr.msk.bf16.gmra.mrb[16].mxu0 %vm156_vm2, %v2535_v24  ;;  %2415 = vmatmul.mubr.msk.bf16.gmra.mrb[16].mxu1 %vm156_vm2, %v2536_v25 }
  0x2b   :  { %2378 = vmatprep.mubr.msk.bf16.mxu0 %vm156_vm2, %v2537_v26  ;;  %2418 = vmatprep.mubr.msk.bf16.mxu1 %vm156_vm2, %v2538_v27 }
  0x32   :  { %2379 = vmatmul.mubr.msk.bf16.gmra.mrb[20].mxu0 %vm156_vm2, %v2539_v28  ;;  %2419 = vmatmul.mubr.msk.bf16.gmra.mrb[20].mxu1 %vm156_vm2, %v2540_v29 }
  0x33   :  { %2382 = vmatprep.mubr.msk.bf16.mxu0 %vm156_vm2, %v2541_v30  ;;  %2422 = vmatprep.mubr.msk.bf16.mxu1 %vm156_vm2, %v2542_v31 }
  0x3a   :  { %2383 = vmatmul.mubr.msk.bf16.gmra.mrb[24].mxu0 %vm156_vm2, %v2543_v32  ;;  %2423 = vmatmul.mubr.msk.bf16.gmra.mrb[24].mxu1 %vm156_vm2, %v2544_v33 }
  0x3b   :  { %2386 = vmatprep.mubr.msk.bf16.mxu0 %vm156_vm2, %v2545_v34  ;;  %2426 = vmatprep.mubr.msk.bf16.mxu1 %vm156_vm2, %v2546_v35 }
  0x42   :  { %2387 = vmatmul.mubr.msk.bf16.gmra.mrb[28].mxu0 %vm156_vm2, %v2547_v36  ;;  %2427 = vmatmul.mubr.msk.bf16.gmra.mrb[28].mxu1 %vm156_vm2, %v2548_v37 }
  0x43   :  { %2390 = vmatprep.mubr.msk.bf16.mxu0 %vm156_vm2, %v2549_v38  ;;  %2430 = vmatprep.mubr.msk.bf16.mxu1 %vm156_vm2, %v2550_v39 }
  0x4a   :  { %2391 = vmatmul.mubr.msk.bf16.gmra.mrb[32].mxu0 %vm156_vm2, %v2551_v40  ;;  %2431 = vmatmul.mubr.msk.bf16.gmra.mrb[32].mxu1 %vm156_vm2, %v2552_v41 }
  0x4b   :  { %2438 = vmatprep.mubr.msk.bf16.mxu0 %vm156_vm2, %v2553_v42  ;;  %2478 = vmatprep.mubr.msk.bf16.mxu1 %vm156_vm2, %v2554_v43 }
  0x52   :  { %2439 = vmatmul.mubr.msk.bf16.vlgmr.msra.gmra.mrb[36].mxu0 %vm156_vm2, %v2555_v44  ;;  %2479 = vmatmul.mubr.msk.bf16.vlgmr.msra.gmra.mrb[36].mxu1 %vm156_vm2, %v2556_v45 }
  0x53   :  { %2442 = vmatprep.mubr.msk.bf16.mxu0 %vm156_vm2, %v2557_v46  ;;  %2482 = vmatprep.mubr.msk.bf16.mxu1 %vm156_vm2, %v2558_v47 }
  0x5a   :  { %2443 = vmatmul.mubr.msk.bf16.gmra.mrb[40].mxu0 %vm156_vm2, %v2559_v48  ;;  %2483 = vmatmul.mubr.msk.bf16.gmra.mrb[40].mxu1 %vm156_vm2, %v2560_v49 }
  0x5b   :  { %2446 = vmatprep.mubr.msk.bf16.mxu0 %vm156_vm2, %v2561_v50  ;;  %2486 = vmatprep.mubr.msk.bf16.mxu1 %vm156_vm2, %v2562_v51 }
  0x62   :  { %2447 = vmatmul.mubr.msk.bf16.gmra.mrb[44].mxu0 %vm156_vm2, %v2563_v52  ;;  %2487 = vmatmul.mubr.msk.bf16.gmra.mrb[44].mxu1 %vm156_vm2, %v2564_v53 }
  0x63   :  { %2450 = vmatprep.mubr.msk.bf16.mxu0 %vm156_vm2, %v2565_v54  ;;  %2490 = vmatprep.mubr.msk.bf16.mxu1 %vm156_vm2, %v2566_v55 }
  0x6a   :  { %2451 = vmatmul.mubr.msk.bf16.gmra.mrb[48].mxu0 %vm156_vm2, %v2567_v56  ;;  %2491 = vmatmul.mubr.msk.bf16.gmra.mrb[48].mxu1 %vm156_vm2, %v2568_v57 }
  0x6b   :  { %2454 = vmatprep.mubr.msk.bf16.mxu0 %vm156_vm2, %v2569_v58  ;;  %2494 = vmatprep.mubr.msk.bf16.mxu1 %vm156_vm2, %v2570_v59 }
  0x72   :  { %2455 = vmatmul.mubr.msk.bf16.gmra.mrb[52].mxu0 %vm156_vm2, %v2571_v60  ;;  %2495 = vmatmul.mubr.msk.bf16.gmra.mrb[52].mxu1 %vm156_vm2, %v2572_v61 }
  0x73   :  { %2458 = vmatprep.mubr.msk.bf16.mxu0 %vm156_vm2, %v2573_v62  ;;  %2498 = vmatprep.mubr.msk.bf16.mxu1 %vm156_vm2, %v2574_v63 }
  0x7a   :  { %2459 = vmatmul.mubr.msk.bf16.gmra.mrb[56].mxu0 %vm156_vm2, %v2575_v0  ;;  %2499 = vmatmul.mubr.msk.bf16.gmra.mrb[56].mxu1 %vm156_vm2, %v2576_v1 }
  0x7b   :  { %2462 = vmatprep.mubr.msk.bf16.mxu0 %vm156_vm2, %v2577_v2  ;;  %2502 = vmatprep.mubr.msk.bf16.mxu1 %vm156_vm2, %v2578_v3 }
  0x82   :  { %2463 = vmatmul.mubr.msk.bf16.gmra.mrb[60].mxu0 %vm156_vm2, %v2579_v4  ;;  %2503 = vmatmul.mubr.msk.bf16.gmra.mrb[60].mxu1 %vm156_vm2, %v2580_v5 }
  0x83   :  { %2466 = vmatprep.mubr.msk.bf16.mxu0 %vm156_vm2, %v2581_v6  ;;  %2506 = vmatprep.mubr.msk.bf16.mxu1 %vm156_vm2, %v2582_v7 }
  0x8a   :  { %2467 = vmatmul.mubr.msk.bf16.gmra.mrb[64].mxu0 %vm156_vm2, %v2583_v8  ;;  %2507 = vmatmul.mubr.msk.bf16.gmra.mrb[64].mxu1 %vm156_vm2, %v2584_v9 }
  0x8b   :  { %2470 = vmatprep.mubr.msk.bf16.mxu0 %vm156_vm2, %v2585_v10  ;;  %2510 = vmatprep.mubr.msk.bf16.mxu1 %vm156_vm2, %v2586_v11 }
  0x92   :  { %2471 = vmatmul.mubr.msk.bf16.gmra.mrb[68].mxu0 %vm156_vm2, %v2587_v12  ;;  %2511 = vmatmul.mubr.msk.bf16.gmra.mrb[68].mxu1 %vm156_vm2, %v2588_v13 }
  0xdd   :  { %v2904_v14 = vpop.f32.mrb[0].mxu0  ;;  %v2906_v15 = vpop.f32.mrb[0].mxu1 }
  0xde   :  { %v2910_v17 = vpop.f32.mrb[1].mxu0  ;;  %v2912_v18 = vpop.f32.mrb[1].mxu1 }
  0xdf   :  { %v2916_v20 = vpop.f32.mrb[2].mxu0  ;;  %v2918_v21 = vpop.f32.mrb[2].mxu1  ;;  %v3378_v9 = vmax.f32 %v2910_v17, %v2912_v18 }
  0xe0   :  { %v2922_v23 = vpop.f32.mrb[3].mxu0  ;;  %v2924_v24 = vpop.f32.mrb[3].mxu1 }
  0xe5   :  { %v2928_v26 = vpop.f32.mrb[4].mxu0  ;;  %v2930_v27 = vpop.f32.mrb[4].mxu1 }
  0xe6   :  { %v2934_v29 = vpop.f32.mrb[5].mxu0  ;;  %v2936_v30 = vpop.f32.mrb[5].mxu1 }
  0xe7   :  { %v2940_v32 = vpop.f32.mrb[6].mxu0  ;;  %v2942_v33 = vpop.f32.mrb[6].mxu1 }
  0xe8   :  { %v2946_v35 = vpop.f32.mrb[7].mxu0  ;;  %v2948_v36 = vpop.f32.mrb[7].mxu1 }
  0xed   :  { %v2952_v38 = vpop.f32.mrb[8].mxu0  ;;  %v2954_v39 = vpop.f32.mrb[8].mxu1 }
  0xee   :  { %v2958_v41 = vpop.f32.mrb[9].mxu0  ;;  %v2960_v42 = vpop.f32.mrb[9].mxu1 }
  0xef   :  { %v2964_v44 = vpop.f32.mrb[10].mxu0  ;;  %v2966_v45 = vpop.f32.mrb[10].mxu1 }
  0xf0   :  { %v2970_v47 = vpop.f32.mrb[11].mxu0  ;;  %v2972_v48 = vpop.f32.mrb[11].mxu1 }
  0xf5   :  { %v2976_v50 = vpop.f32.mrb[12].mxu0  ;;  %v2978_v51 = vpop.f32.mrb[12].mxu1 }
  0xf6   :  { %v2982_v53 = vpop.f32.mrb[13].mxu0  ;;  %v2984_v54 = vpop.f32.mrb[13].mxu1 }
  0xf7   :  { %v2988_v56 = vpop.f32.mrb[14].mxu0  ;;  %v2990_v57 = vpop.f32.mrb[14].mxu1 }
  0xf8   :  { %v2994_v59 = vpop.f32.mrb[15].mxu0  ;;  %v2996_v60 = vpop.f32.mrb[15].mxu1 }
  0xfd   :  { %v3000_v62 = vpop.f32.mrb[16].mxu0  ;;  %v3002_v63 = vpop.f32.mrb[16].mxu1 }
  0xfe   :  { %v3006_v1 = vpop.f32.mrb[17].mxu0  ;;  %v3008_v2 = vpop.f32.mrb[17].mxu1 }
  0xff   :  { %v3012_v4 = vpop.f32.mrb[18].mxu0  ;;  %v3014_v5 = vpop.f32.mrb[18].mxu1 }
 0x100   :  { %v3018_v7 = vpop.f32.mrb[19].mxu0  ;;  %v3020_v8 = vpop.f32.mrb[19].mxu1 }
 0x105   :  { %v3024_v10 = vpop.f32.mrb[20].mxu0  ;;  %v3026_v11 = vpop.f32.mrb[20].mxu1 }
 0x106   :  { %v3030_v13 = vpop.f32.mrb[21].mxu0  ;;  %v3032_v3 = vpop.f32.mrb[21].mxu1 }
 0x107   :  { %v3036_v0 = vpop.f32.mrb[22].mxu0  ;;  %v3038_v61 = vpop.f32.mrb[22].mxu1 }
 0x108   :  { %v3042_v58 = vpop.f32.mrb[23].mxu0  ;;  %v3044_v55 = vpop.f32.mrb[23].mxu1 }
 0x109   :  { %3352 = vst [vmem:[#allocation2_spill] sm:$0xff] %v3044_v55 }
 0x10d   :  { %v3048_v52 = vpop.f32.mrb[24].mxu0  ;;  %v3050_v49 = vpop.f32.mrb[24].mxu1 }
 0x10e   :  { %3353 = vst [vmem:[#allocation3_spill] sm:$0xff] %v3048_v52  ;;  %3354 = vst [vmem:[#allocation4_spill] sm:$0xff] %v3050_v49  ;;  %v3054_v46 = vpop.f32.mrb[25].mxu0  ;;  %v3056_v43 = vpop.f32.mrb[25].mxu1 }
 0x10f   :  { %3355 = vst [vmem:[#allocation5_spill] sm:$0xff] %v3054_v46  ;;  %3356 = vst [vmem:[#allocation6_spill] sm:$0xff] %v3056_v43  ;;  %v3060_v40 = vpop.f32.mrb[26].mxu0  ;;  %v3062_v37 = vpop.f32.mrb[26].mxu1  ;;  %v3126_v43 = vld [vmem:[%s3325_s2] ss:$0 sm:$0xff] }
 0x110   :  { %3357 = vst [vmem:[#allocation7_spill] sm:$0xff] %v3060_v40  ;;  %3358 = vst [vmem:[#allocation8_spill] sm:$0xff] %v3062_v37  ;;  %v3066_v34 = vpop.f32.mrb[27].mxu0  ;;  %v3068_v31 = vpop.f32.mrb[27].mxu1  ;;  %v3377_v40 = vmax.f32 %v2904_v14, %v2906_v15 }
 0x111   :  { %3359 = vst [vmem:[#allocation9_spill] sm:$0xff] %v3066_v34  ;;  %3360 = vst [vmem:[#allocation10_spill] sm:$0xff] %v3068_v31 }
 0x115   :  { %v3072_v28 = vpop.f32.mrb[28].mxu0  ;;  %v3074_v25 = vpop.f32.mrb[28].mxu1 }
 0x116   :  { %3361 = vst [vmem:[#allocation11_spill] sm:$0xff] %v3072_v28  ;;  %3362 = vst [vmem:[#allocation12_spill] sm:$0xff] %v3074_v25  ;;  %v3078_v22 = vpop.f32.mrb[29].mxu0  ;;  %v3080_v19 = vpop.f32.mrb[29].mxu1 }
 0x117   :  { %3363 = vst [vmem:[#allocation13_spill] sm:$0xff] %v3078_v22  ;;  %3364 = vst [vmem:[#allocation14_spill] sm:$0xff] %v3080_v19  ;;  %v3084_v16 = vpop.f32.mrb[30].mxu0  ;;  %v3086_v37 = vpop.f32.mrb[30].mxu1 }
 0x118   :  { %3365 = vst [vmem:[#allocation15_spill] sm:$0xff] %v3084_v16  ;;  %3366 = vst [vmem:[#allocation16_spill] sm:$0xff] %v3086_v37  ;;  %v3090_v31 = vpop.f32.mrb[31].mxu0  ;;  %v3092_v34 = vpop.f32.mrb[31].mxu1 }
 0x119   :  { %3367 = vst [vmem:[#allocation17_spill] sm:$0xff] %v3090_v31  ;;  %3368 = vst [vmem:[#allocation18_spill] sm:$0xff] %v3092_v34 }
 0x11d   :  { %v3096_v25 = vpop.f32.mrb[32].mxu0  ;;  %v3098_v28 = vpop.f32.mrb[32].mxu1 }
 0x11e   :  { %3369 = vst [vmem:[#allocation19_spill] sm:$0xff] %v3096_v25  ;;  %3370 = vst [vmem:[#allocation20_spill] sm:$0xff] %v3098_v28  ;;  %v3102_v19 = vpop.f32.mrb[33].mxu0  ;;  %v3104_v22 = vpop.f32.mrb[33].mxu1 }
 0x11f   :  { %3371 = vst [vmem:[#allocation21_spill] sm:$0xff] %v3102_v19  ;;  %3372 = vst [vmem:[#allocation22_spill] sm:$0xff] %v3104_v22  ;;  %v3108_v37 = vpop.f32.mrb[34].mxu0  ;;  %v3110_v16 = vpop.f32.mrb[34].mxu1 }
 0x120   :  { %3373 = vst [vmem:[#allocation23_spill] sm:$0xff] %v3108_v37  ;;  %3374 = vst [vmem:[#allocation24_spill] sm:$0xff] %v3110_v16  ;;  %v3114_v34 = vpop.f32.mrb[35].mxu0  ;;  %v3116_v31 = vpop.f32.mrb[35].mxu1 }
 0x121   :  { %3375 = vst [vmem:[#allocation25_spill] sm:$0xff] %v3114_v34  ;;  %3376 = vst [vmem:[#allocation26_spill] sm:$0xff] %v3116_v31  ;;  %v3379_v31 = vmax.f32 %v2916_v20, %v2918_v21 }
 0x125   :  { %v2440_v28 = vpop.f32.mrb[36].mxu0  ;;  %v2480_v25 = vpop.f32.mrb[36].mxu1 }
 0x126   :  { %v1149_v6 = vmax.f32 %v3377_v40, %v2440_v28  ;;  %v1004_v22 = vpop.f32.mrb[37].mxu0  ;;  %v1398_v19 = vpop.f32.mrb[37].mxu1  ;;  %v3380_v40 = vmax.f32 %v2922_v23, %v2924_v24 }
 0x127   :  { %v1147_v16 = vmax.f32 %v3378_v9, %v1004_v22  ;;  %v2441_v37 = vpop.f32.mrb[38].mxu0  ;;  %v2481_v46 = vpop.f32.mrb[38].mxu1 }
 0x128   :  { %v1543_v12 = vmax.f32 %v1149_v6, %v2480_v25  ;;  %v1150_v34 = vmax.f32 %v3379_v31, %v2441_v37  ;;  %v1007_v14 = vpop.f32.mrb[39].mxu0  ;;  %v1401_v15 = vpop.f32.mrb[39].mxu1 }
 0x129   :  { %v1541_v28 = vmax.f32 %v1147_v16, %v1398_v19  ;;  %v1148_v49 = vmax.f32 %v3380_v40, %v1007_v14  ;;  %v3381_v16 = vmax.f32 %v2928_v26, %v2930_v27 }
 0x12a   :  { %v1586_v52 = vadd.f32 %v3126_v43, %v1543_v12  ;;  %v1544_v55 = vmax.f32 %v1150_v34, %v2481_v46  ;;  %v3382_v34 = vmax.f32 %v2934_v29, %v2936_v30 }
 0x12b   :  { %v1584_v17 = vadd.f32 %v3126_v43, %v1541_v28  ;;  %v1542_v18 = vmax.f32 %v1148_v49, %v1401_v15 }
 0x12c   :  { %v1587_v22 = vadd.f32 %v3126_v43, %v1544_v55  ;;  %v1622_v21 = vmax.f32 %v1586_v52, 0.0  ;;  %v3383_v52 = vmax.f32 %v2940_v32, %v2942_v33 }
 0x12d   :  { %v1585_v25 = vadd.f32 %v3126_v43, %v1542_v18  ;;  %v2444_v6 = vpop.f32.mrb[40].mxu0  ;;  %v2484_v20 = vpop.f32.mrb[40].mxu1  ;;  %v1620_v37 = vmax.f32 %v1584_v17, 0.0  ;;  %v3384_v17 = vmax.f32 %v2946_v35, %v2948_v36 }
 0x12e   :  { %v1623_v31 = vmax.f32 %v1587_v22, 0.0  ;;  %v1153_v19 = vmax.f32 %v3381_v16, %v2444_v6  ;;  %v1020_v23 = vpop.f32.mrb[41].mxu0  ;;  %v1414_v24 = vpop.f32.mrb[41].mxu1 }
 0x12f   :  { %v1621_v9 = vmax.f32 %v1585_v25, 0.0  ;;  %v1151_v46 = vmax.f32 %v3382_v34, %v1020_v23  ;;  %v2445_v49 = vpop.f32.mrb[42].mxu0  ;;  %v2485_v55 = vpop.f32.mrb[42].mxu1 }
 0x130   :  { %v2175_v12 = vpack.c.bf16 %v1623_v31, %v1622_v21  ;;  %v1547_v14 = vmax.f32 %v1153_v19, %v2484_v20  ;;  %v1154_v15 = vmax.f32 %v3383_v52, %v2445_v49  ;;  %v1023_v28 = vpop.f32.mrb[43].mxu0  ;;  %v1417_v40 = vpop.f32.mrb[43].mxu1  ;;  %v3385_v21 = vmax.f32 %v2952_v38, %v2954_v39 }
 0x131   :  { %v2170_v26 = vpack.c.bf16 %v1621_v9, %v1620_v37  ;;  %v1545_v27 = vmax.f32 %v1151_v46, %v1414_v24  ;;  %v1152_v18 = vmax.f32 %v3384_v17, %v1023_v28  ;;  %v3386_v37 = vmax.f32 %v2958_v41, %v2960_v42 }
 0x132   :  { %2257 = vst [vmem:[%s3326_s3 + $0x8] sm:$0xff] %v2175_v12   ;;  %v1590_v29 = vadd.f32 %v3126_v43, %v1547_v14  ;;  %v1548_v30 = vmax.f32 %v1154_v15, %v2485_v55  ;;  %v3387_v12 = vmax.f32 %v2964_v44, %v2966_v45  ;;  %v3388_v28 = vmax.f32 %v2970_v47, %v2972_v48 }
 0x133   :  { %2171 = vst [vmem:[%s3326_s3] sm:$0xff] %v2170_v26   ;;  %v1588_v32 = vadd.f32 %v3126_v43, %v1545_v27  ;;  %v1546_v33 = vmax.f32 %v1152_v18, %v1417_v40 }
 0x134   :  { %v1591_v22 = vadd.f32 %v3126_v43, %v1548_v30  ;;  %v1626_v6 = vmax.f32 %v1590_v29, 0.0  ;;  %v3389_v29 = vmax.f32 %v2976_v50, %v2978_v51 }
 0x135   :  { %v1589_v25 = vadd.f32 %v3126_v43, %v1546_v33  ;;  %v2448_v35 = vpop.f32.mrb[44].mxu0  ;;  %v2488_v36 = vpop.f32.mrb[44].mxu1  ;;  %v1624_v23 = vmax.f32 %v1588_v32, 0.0 }
 0x136   :  { %v1627_v20 = vmax.f32 %v1591_v22, 0.0  ;;  %v1157_v31 = vmax.f32 %v3385_v21, %v2448_v35  ;;  %v1036_v16 = vpop.f32.mrb[45].mxu0  ;;  %v1430_v19 = vpop.f32.mrb[45].mxu1  ;;  %v3390_v35 = vmax.f32 %v2982_v53, %v2984_v54 }
 0x137   :  { %v1625_v24 = vmax.f32 %v1589_v25, 0.0  ;;  %v1155_v9 = vmax.f32 %v3386_v37, %v1036_v16  ;;  %v2449_v34 = vpop.f32.mrb[46].mxu0  ;;  %v2489_v46 = vpop.f32.mrb[46].mxu1  ;;  %v3391_v16 = vmax.f32 %v2988_v56, %v2990_v57  ;;  %v3392_v37 = vmax.f32 %v2994_v59, %v2996_v60 }
 0x138   :  { %v2185_v49 = vpack.c.bf16 %v1627_v20, %v1626_v6  ;;  %v1551_v55 = vmax.f32 %v1157_v31, %v2488_v36  ;;  %v1158_v14 = vmax.f32 %v3387_v12, %v2449_v34  ;;  %v1039_v52 = vpop.f32.mrb[47].mxu0  ;;  %v1433_v15 = vpop.f32.mrb[47].mxu1  ;;  %v3393_v12 = vmax.f32 %v3000_v62, %v3002_v63 }
 0x139   :  { %v2180_v38 = vpack.c.bf16 %v1625_v24, %v1624_v23  ;;  %v1549_v39 = vmax.f32 %v1155_v9, %v1430_v19  ;;  %v1156_v40 = vmax.f32 %v3388_v28, %v1039_v52  ;;  %v3394_v28 = vmax.f32 %v3006_v1, %v3008_v2 }
 0x13a   :  { %2259 = vst [vmem:[%s3326_s3 + $0x18] sm:$0xff] %v2185_v49   ;;  %v1594_v41 = vadd.f32 %v3126_v43, %v1551_v55  ;;  %v1552_v42 = vmax.f32 %v1158_v14, %v2489_v46 }
 0x13b   :  { %2258 = vst [vmem:[%s3326_s3 + $0x10] sm:$0xff] %v2180_v38   ;;  %v1592_v44 = vadd.f32 %v3126_v43, %v1549_v39  ;;  %v1550_v45 = vmax.f32 %v1156_v40, %v1433_v15 }
 0x13c   :  { %v1595_v26 = vadd.f32 %v3126_v43, %v1552_v42  ;;  %v1630_v17 = vmax.f32 %v1594_v41, 0.0 }
 0x13d   :  { %v1593_v27 = vadd.f32 %v3126_v43, %v1550_v45  ;;  %v2452_v47 = vpop.f32.mrb[48].mxu0  ;;  %v2492_v48 = vpop.f32.mrb[48].mxu1  ;;  %v1628_v22 = vmax.f32 %v1592_v44, 0.0 }
 0x13e   :  { %v1631_v18 = vmax.f32 %v1595_v26, 0.0  ;;  %v1161_v30 = vmax.f32 %v3389_v29, %v2452_v47  ;;  %v1052_v32 = vpop.f32.mrb[49].mxu0  ;;  %v1446_v33 = vpop.f32.mrb[49].mxu1  ;;  %v3395_v26 = vmax.f32 %v3012_v4, %v3014_v5 }
 0x13f   :  { %v1629_v25 = vmax.f32 %v1593_v27, 0.0  ;;  %v1159_v36 = vmax.f32 %v3390_v35, %v1052_v32  ;;  %v2453_v6 = vpop.f32.mrb[50].mxu0  ;;  %v2493_v20 = vpop.f32.mrb[50].mxu1 }
 0x140   :  { %v2195_v21 = vpack.c.bf16 %v1631_v18, %v1630_v17  ;;  %v1555_v31 = vmax.f32 %v1161_v30, %v2492_v48  ;;  %v1162_v19 = vmax.f32 %v3391_v16, %v2453_v6  ;;  %v1055_v23 = vpop.f32.mrb[51].mxu0  ;;  %v1449_v24 = vpop.f32.mrb[51].mxu1  ;;  %v3396_v17 = vmax.f32 %v3018_v7, %v3020_v8 }
 0x141   :  { %v2190_v50 = vpack.c.bf16 %v1629_v25, %v1628_v22  ;;  %v1553_v51 = vmax.f32 %v1159_v36, %v1446_v33  ;;  %v1160_v9 = vmax.f32 %v3392_v37, %v1055_v23  ;;  %v3397_v22 = vmax.f32 %v3024_v10, %v3026_v11 }
 0x142   :  { %2261 = vst [vmem:[%s3326_s3 + $0x28] sm:$0xff] %v2195_v21   ;;  %v1598_v53 = vadd.f32 %v3126_v43, %v1555_v31  ;;  %v1556_v54 = vmax.f32 %v1162_v19, %v2493_v20  ;;  %v3398_v21 = vmax.f32 %v3030_v13, %v3032_v3 }
 0x143   :  { %2260 = vst [vmem:[%s3326_s3 + $0x20] sm:$0xff] %v2190_v50   ;;  %v1596_v56 = vadd.f32 %v3126_v43, %v1553_v51  ;;  %v1554_v57 = vmax.f32 %v1160_v9, %v1449_v24  ;;  %v3399_v50 = vmax.f32 %v3036_v0, %v3038_v61 }
 0x144   :  { %v1599_v34 = vadd.f32 %v3126_v43, %v1556_v54  ;;  %v1634_v49 = vmax.f32 %v1598_v53, 0.0  ;;  %v3400_v53 = vld [vmem:[#allocation2_spill] sm:$0xff] }
 0x145   :  { %v1597_v46 = vadd.f32 %v3126_v43, %v1554_v57  ;;  %v2456_v59 = vpop.f32.mrb[52].mxu0  ;;  %v2496_v60 = vpop.f32.mrb[52].mxu1  ;;  %v1632_v38 = vmax.f32 %v1596_v56, 0.0  ;;  %v3401_v54 = vmax.f32 %v3042_v58, %v3400_v53 }
 0x146   :  { %v1635_v55 = vmax.f32 %v1599_v34, 0.0  ;;  %v1165_v14 = vmax.f32 %v3393_v12, %v2456_v59  ;;  %v1068_v52 = vpop.f32.mrb[53].mxu0  ;;  %v1462_v15 = vpop.f32.mrb[53].mxu1 }
 0x147   :  { %v1633_v39 = vmax.f32 %v1597_v46, 0.0  ;;  %v1163_v40 = vmax.f32 %v3394_v28, %v1068_v52  ;;  %v2457_v41 = vpop.f32.mrb[54].mxu0  ;;  %v2497_v42 = vpop.f32.mrb[54].mxu1  ;;  %v3405_v28 = vld [vmem:[#allocation5_spill] sm:$0xff] }
 0x148   :  { %v2205_v44 = vpack.c.bf16 %v1635_v55, %v1634_v49  ;;  %v1559_v45 = vmax.f32 %v1165_v14, %v2496_v60  ;;  %v1166_v27 = vmax.f32 %v3395_v26, %v2457_v41  ;;  %v1071_v47 = vpop.f32.mrb[55].mxu0  ;;  %v1465_v48 = vpop.f32.mrb[55].mxu1  ;;  %v3402_v49 = vld [vmem:[#allocation3_spill] sm:$0xff]  ;;  %v3403_v55 = vld [vmem:[#allocation4_spill] sm:$0xff] }
 0x149   :  { %v2200_v62 = vpack.c.bf16 %v1633_v39, %v1632_v38  ;;  %v1557_v63 = vmax.f32 %v1163_v40, %v1462_v15  ;;  %v1164_v18 = vmax.f32 %v3396_v17, %v1071_v47  ;;  %v3404_v12 = vmax.f32 %v3402_v49, %v3403_v55  ;;  %v3406_v40 = vld [vmem:[#allocation6_spill] sm:$0xff]  ;;  %v3408_v47 = vld [vmem:[#allocation7_spill] sm:$0xff] }
 0x14a   :  { %2263 = vst [vmem:[%s3326_s3 + $0x38] sm:$0xff] %v2205_v44   ;;  %v1602_v1 = vadd.f32 %v3126_v43, %v1559_v45  ;;  %v1560_v2 = vmax.f32 %v1166_v27, %v2497_v42  ;;  %v3407_v41 = vmax.f32 %v3405_v28, %v3406_v40  ;;  %v3424_v49 = vld [vmem:[#allocation18_spill] sm:$0xff] }
 0x14b   :  { %2262 = vst [vmem:[%s3326_s3 + $0x30] sm:$0xff] %v2200_v62   ;;  %v1600_v4 = vadd.f32 %v3126_v43, %v1557_v63  ;;  %v1558_v5 = vmax.f32 %v1164_v18, %v1465_v48  ;;  %v3409_v48 = vld [vmem:[#allocation8_spill] sm:$0xff] }
 0x14c   :  { %v1603_v29 = vadd.f32 %v3126_v43, %v1560_v2  ;;  %v1638_v32 = vmax.f32 %v1602_v1, 0.0  ;;  %v3410_v62 = vmax.f32 %v3408_v47, %v3409_v48 }
 0x14d   :  { %v1601_v30 = vadd.f32 %v3126_v43, %v1558_v5  ;;  %v2460_v7 = vpop.f32.mrb[56].mxu0  ;;  %v2500_v8 = vpop.f32.mrb[56].mxu1  ;;  %v1636_v6 = vmax.f32 %v1600_v4, 0.0  ;;  %v3411_v4 = vld [vmem:[#allocation9_spill] sm:$0xff]  ;;  %v3412_v5 = vld [vmem:[#allocation10_spill] sm:$0xff] }
 0x14e   :  { %v1639_v33 = vmax.f32 %v1603_v29, 0.0  ;;  %v1169_v25 = vmax.f32 %v3397_v22, %v2460_v7  ;;  %v1084_v35 = vpop.f32.mrb[57].mxu0  ;;  %v1478_v36 = vpop.f32.mrb[57].mxu1  ;;  %v3413_v29 = vmax.f32 %v3411_v4, %v3412_v5 }
 0x14f   :  { %v1637_v20 = vmax.f32 %v1601_v30, 0.0  ;;  %v1167_v31 = vmax.f32 %v3398_v21, %v1084_v35  ;;  %v2461_v16 = vpop.f32.mrb[58].mxu0  ;;  %v2501_v19 = vpop.f32.mrb[58].mxu1  ;;  %v3414_v21 = vld [vmem:[#allocation11_spill] sm:$0xff] }
 0x150   :  { %v2215_v23 = vpack.c.bf16 %v1639_v33, %v1638_v32  ;;  %v1563_v24 = vmax.f32 %v1169_v25, %v2500_v8  ;;  %v1170_v51 = vmax.f32 %v3399_v50, %v2461_v16  ;;  %v1087_v37 = vpop.f32.mrb[59].mxu0  ;;  %v1481_v9 = vpop.f32.mrb[59].mxu1 }
 0x151   :  { %v2210_v10 = vpack.c.bf16 %v1637_v20, %v1636_v6  ;;  %v1561_v11 = vmax.f32 %v1167_v31, %v1478_v36  ;;  %v1168_v56 = vmax.f32 %v3401_v54, %v1087_v37  ;;  %v3415_v31 = vld [vmem:[#allocation12_spill] sm:$0xff]  ;;  %v3417_v37 = vld [vmem:[#allocation13_spill] sm:$0xff] }
 0x152   :  { %2265 = vst [vmem:[%s3326_s3 + $0x48] sm:$0xff] %v2215_v23   ;;  %v1606_v3 = vadd.f32 %v3126_v43, %v1563_v24  ;;  %v1564_v13 = vmax.f32 %v1170_v51, %v2501_v19  ;;  %v3416_v16 = vmax.f32 %v3414_v21, %v3415_v31  ;;  %v3436_v21 = vld [vmem:[#allocation26_spill] sm:$0xff] }
 0x153   :  { %2264 = vst [vmem:[%s3326_s3 + $0x40] sm:$0xff] %v2210_v10   ;;  %v1604_v61 = vadd.f32 %v3126_v43, %v1561_v11  ;;  %v1562_v0 = vmax.f32 %v1168_v56, %v1481_v9  ;;  %v3418_v9 = vld [vmem:[#allocation14_spill] sm:$0xff] }
 0x154   :  { %v1607_v57 = vadd.f32 %v3126_v43, %v1564_v13  ;;  %v1642_v59 = vmax.f32 %v1606_v3, 0.0  ;;  %v3419_v10 = vmax.f32 %v3417_v37, %v3418_v9  ;;  %v3420_v13 = vld [vmem:[#allocation15_spill] sm:$0xff] }
 0x155   :  { %v1605_v34 = vadd.f32 %v3126_v43, %v1562_v0  ;;  %v2464_v58 = vpop.f32.mrb[60].mxu0  ;;  %v2504_v46 = vpop.f32.mrb[60].mxu1  ;;  %v1640_v38 = vmax.f32 %v1604_v61, 0.0  ;;  %v3421_v61 = vld [vmem:[#allocation16_spill] sm:$0xff] }
 0x156   :  { %v1643_v60 = vmax.f32 %v1607_v57, 0.0  ;;  %v1173_v14 = vmax.f32 %v3404_v12, %v2464_v58  ;;  %v1100_v52 = vpop.f32.mrb[61].mxu0  ;;  %v1494_v15 = vpop.f32.mrb[61].mxu1  ;;  %v3422_v0 = vmax.f32 %v3420_v13, %v3421_v61 }
 0x157   :  { %v1641_v39 = vmax.f32 %v1605_v34, 0.0  ;;  %v1171_v42 = vmax.f32 %v3407_v41, %v1100_v52  ;;  %v2465_v44 = vpop.f32.mrb[62].mxu0  ;;  %v2505_v45 = vpop.f32.mrb[62].mxu1 }
 0x158   :  { %v2225_v26 = vpack.c.bf16 %v1643_v60, %v1642_v59  ;;  %v1567_v27 = vmax.f32 %v1173_v14, %v2504_v46  ;;  %v1174_v63 = vmax.f32 %v3410_v62, %v2465_v44  ;;  %v1103_v17 = vpop.f32.mrb[63].mxu0  ;;  %v1497_v18 = vpop.f32.mrb[63].mxu1  ;;  %v3423_v60 = vld [vmem:[#allocation17_spill] sm:$0xff] }
 0x159   :  { %v2220_v1 = vpack.c.bf16 %v1641_v39, %v1640_v38  ;;  %v1565_v2 = vmax.f32 %v1171_v42, %v1494_v15  ;;  %v1172_v30 = vmax.f32 %v3413_v29, %v1103_v17  ;;  %v3425_v55 = vmax.f32 %v3423_v60, %v3424_v49 }
 0x15a   :  { %2267 = vst [vmem:[%s3326_s3 + $0x58] sm:$0xff] %v2225_v26   ;;  %v1610_v7 = vadd.f32 %v3126_v43, %v1567_v27  ;;  %v1568_v8 = vmax.f32 %v1174_v63, %v2505_v45  ;;  %v3426_v45 = vld [vmem:[#allocation19_spill] sm:$0xff]  ;;  %v3427_v26 = vld [vmem:[#allocation20_spill] sm:$0xff] }
 0x15b   :  { %2266 = vst [vmem:[%s3326_s3 + $0x50] sm:$0xff] %v2220_v1   ;;  %v1608_v32 = vadd.f32 %v3126_v43, %v1565_v2  ;;  %v1566_v33 = vmax.f32 %v1172_v30, %v1497_v18  ;;  %v3428_v27 = vmax.f32 %v3426_v45, %v3427_v26  ;;  %v3429_v18 = vld [vmem:[#allocation21_spill] sm:$0xff]  ;;  %v3430_v1 = vld [vmem:[#allocation22_spill] sm:$0xff] }
 0x15c   :  { %v1611_v22 = vadd.f32 %v3126_v43, %v1568_v8  ;;  %v1646_v6 = vmax.f32 %v1610_v7, 0.0  ;;  %v3431_v2 = vmax.f32 %v3429_v18, %v3430_v1  ;;  %v3432_v8 = vld [vmem:[#allocation23_spill] sm:$0xff] }
 0x15d   :  { %v1609_v25 = vadd.f32 %v3126_v43, %v1566_v33  ;;  %v2468_v35 = vpop.f32.mrb[64].mxu0  ;;  %v2508_v36 = vpop.f32.mrb[64].mxu1  ;;  %v1644_v50 = vmax.f32 %v1608_v32, 0.0  ;;  %v3433_v32 = vld [vmem:[#allocation24_spill] sm:$0xff] }
 0x15e   :  { %v1647_v20 = vmax.f32 %v1611_v22, 0.0  ;;  %v1177_v19 = vmax.f32 %v3416_v16, %v2468_v35  ;;  %v1116_v23 = vpop.f32.mrb[65].mxu0  ;;  %v1510_v24 = vpop.f32.mrb[65].mxu1  ;;  %v3434_v33 = vmax.f32 %v3432_v8, %v3433_v32 }
 0x15f   :  { %v1645_v51 = vmax.f32 %v1609_v25, 0.0  ;;  %v1175_v11 = vmax.f32 %v3419_v10, %v1116_v23  ;;  %v2469_v53 = vpop.f32.mrb[66].mxu0  ;;  %v2509_v54 = vpop.f32.mrb[66].mxu1 }
 0x160   :  { %v2235_v56 = vpack.c.bf16 %v1647_v20, %v1646_v6  ;;  %v1571_v3 = vmax.f32 %v1177_v19, %v2508_v36  ;;  %v1178_v57 = vmax.f32 %v3422_v0, %v2469_v53  ;;  %v1119_v34 = vpop.f32.mrb[67].mxu0  ;;  %v1513_v58 = vpop.f32.mrb[67].mxu1  ;;  %v3435_v20 = vld [vmem:[#allocation25_spill] sm:$0xff] }
 0x161   :  { %v2230_v46 = vpack.c.bf16 %v1645_v51, %v1644_v50  ;;  %v1569_v59 = vmax.f32 %v1175_v11, %v1510_v24  ;;  %v1176_v12 = vmax.f32 %v3425_v55, %v1119_v34  ;;  %v3437_v31 = vmax.f32 %v3435_v20, %v3436_v21 }
 0x162   :  { %2269 = vst [vmem:[%s3326_s3 + $0x68] sm:$0xff] %v2235_v56   ;;  %v1614_v14 = vadd.f32 %v3126_v43, %v1571_v3  ;;  %v1572_v52 = vmax.f32 %v1178_v57, %v2509_v54 }
 0x163   :  { %2268 = vst [vmem:[%s3326_s3 + $0x60] sm:$0xff] %v2230_v46   ;;  %v1612_v15 = vadd.f32 %v3126_v43, %v1569_v59  ;;  %v1570_v38 = vmax.f32 %v1176_v12, %v1513_v58 }
 0x164   :  { %v1615_v39 = vadd.f32 %v3126_v43, %v1572_v52  ;;  %v1650_v42 = vmax.f32 %v1614_v14, 0.0 }
 0x165   :  { %v1613_v28 = vadd.f32 %v3126_v43, %v1570_v38  ;;  %v2472_v40 = vpop.f32.mrb[68].mxu0  ;;  %v2512_v41 = vpop.f32.mrb[68].mxu1  ;;  %v1648_v63 = vmax.f32 %v1612_v15, 0.0 }
 0x166   :  { %v1651_v44 = vmax.f32 %v1615_v39, 0.0  ;;  %v1181_v47 = vmax.f32 %v3428_v27, %v2472_v40  ;;  %v1132_v48 = vpop.f32.mrb[69].mxu0  ;;  %v1526_v62 = vpop.f32.mrb[69].mxu1 }
 0x167   :  { %v1649_v17 = vmax.f32 %v1613_v28, 0.0  ;;  %v1179_v4 = vmax.f32 %v3431_v2, %v1132_v48  ;;  %v2473_v5 = vpop.f32.mrb[70].mxu0  ;;  %v2513_v29 = vpop.f32.mrb[70].mxu1 }
 0x168   :  { %v2245_v30 = vpack.c.bf16 %v1651_v44, %v1650_v42  ;;  %v1575_v7 = vmax.f32 %v1181_v47, %v2512_v41  ;;  %v1182_v22 = vmax.f32 %v3434_v33, %v2473_v5  ;;  %v1135_v25 = vpop.f32.mrb[71].mxu0  ;;  %v1529_v35 = vpop.f32.mrb[71].mxu1 }
 0x169   :  { %v2240_v36 = vpack.c.bf16 %v1649_v17, %v1648_v63  ;;  %v1573_v6 = vmax.f32 %v1179_v4, %v1526_v62  ;;  %v1180_v16 = vmax.f32 %v3437_v31, %v1135_v25 }
 0x16a   :  { %2271 = vst [vmem:[%s3326_s3 + $0x78] sm:$0xff] %v2245_v30   ;;  %v1618_v19 = vadd.f32 %v3126_v43, %v1575_v7  ;;  %v1576_v23 = vmax.f32 %v1182_v22, %v2513_v29 }
 0x16b   :  { %2270 = vst [vmem:[%s3326_s3 + $0x70] sm:$0xff] %v2240_v36   ;;  %v1616_v24 = vadd.f32 %v3126_v43, %v1573_v6  ;;  %v1574_v50 = vmax.f32 %v1180_v16, %v1529_v35 }
 0x16c   :  { %v1619_v51 = vadd.f32 %v3126_v43, %v1576_v23  ;;  %v1654_v9 = vmax.f32 %v1618_v19, 0.0 }
 0x16d   :  { %v1617_v37 = vadd.f32 %v3126_v43, %v1574_v50  ;;  %v1652_v11 = vmax.f32 %v1616_v24, 0.0 }
 0x16e   :  { %v1655_v10 = vmax.f32 %v1619_v51, 0.0 }
 0x16f   :  { %v1653_v53 = vmax.f32 %v1617_v37, 0.0 }
 0x170   :  { %v2255_v54 = vpack.c.bf16 %v1655_v10, %v1654_v9 }
 0x171   :  { %v2250_v56 = vpack.c.bf16 %v1653_v53, %v1652_v11 }
 0x172   :  { %2273 = vst [vmem:[%s3326_s3 + $0x88] sm:$0xff] %v2255_v54  }
 0x173   :  { %2272 = vst [vmem:[%s3326_s3 + $0x80] sm:$0xff] %v2250_v56  }

// kernel: cnn_forward.5
= control target key start
LH: loop header
LB: loop body
LE: loop exit
PB: predicated region body
PF: predicated region fallthrough
CT: control target
= control target key end

     0   :  { %v556_v1 = vmov 0.0   ;;  %vm557_vm0 = vmmov 0   ;;  %vm200_vm1 = vcmask 523264   ;;  %v397_v47 = vlaneseq  ;;  %s703_s1 = inlined_call_operand.vmem [shape: bf16[320,128], index: 1, kind: input, shape index: {}]   ;;  %s704_s0 = inlined_call_operand.vmem [shape: bf16[8,320], index: 0, kind: input, shape index: {}]   ;;  %s705_s3 = inlined_call_operand.vmem [shape: bf16[128,128], index: 3, kind: input, shape index: {}]   ;;  %s706_s2 = inlined_call_operand.vmem [shape: f32[1,128], index: 2, kind: input, shape index: {}]   ;;  %s707_s4 = inlined_call_operand.vmem [shape: f32[1,128], index: 4, kind: input, shape index: {}]   ;;  %s708_s5 = inlined_call_operand.vmem [shape: f32[8,128], index: 5, kind: output, shape index: {}]  }
   0x1   :  { %v521_v0 = vld [vmem:[%s703_s1 + $0x40] sm:$0xff]   ;;  %487 = vmatprep.subr.bf16.mxu1 %v556_v1  ;;  %495 = vmatprep.mubr.msk.bf16.mxu1 %vm557_vm0, %v556_v1  ;;  %v523_v3 = vld [vmem:[%s703_s1 + $0x48] sm:$0xff]   ;;  %v525_v5 = vld [vmem:[%s703_s1 + $0x50] sm:$0xff]  }
   0x2   :  { %v522_v2 = vld [vmem:[%s703_s1] sm:$0xff]   ;;  %451 = vmatprep.subr.bf16.mxu0 %v521_v0  ;;  %v524_v4 = vld [vmem:[%s703_s1 + $0x8] sm:$0xff]   ;;  %v526_v6 = vld [vmem:[%s703_s1 + $0x10] sm:$0xff]   ;;  %v398_v48 = vand.u32 127, %v397_v47 }
   0x3   :  { %452 = vmatpush3.bf16.msra.mxu0 %v522_v2  ;;  %v527_v7 = vld [vmem:[%s703_s1 + $0x58] sm:$0xff]   ;;  %v531_v8 = vld [vmem:[%s703_s1 + $0x80] sm:$0xff]   ;;  %v534_v11 = vld [vmem:[%s703_s1 + $0x88] sm:$0xff]  }
   0x4   :  { %453 = vmatprep.subr.bf16.mxu0 %v523_v3  ;;  %v528_v9 = vld [vmem:[%s703_s1 + $0x18] sm:$0xff]   ;;  %v529_v10 = vld [vmem:[%s703_s1 + $0x60] sm:$0xff]   ;;  %488 = vmatpush3.bf16.msra.mxu1 %v531_v8  ;;  %v532_v13 = vld [vmem:[%s703_s1 + $0x68] sm:$0xff]   ;;  %vm399_vm2 = vcmp.lt.s32.totalorder %v398_v48, 10 }
   0x5   :  { %489 = vmatprep.subr.bf16.mxu1 %v556_v1  ;;  %v530_v12 = vld [vmem:[%s703_s1 + $0x20] sm:$0xff]   ;;  %v537_v14 = vld [vmem:[%s703_s1 + $0x90] sm:$0xff]   ;;  %v533_v15 = vld [vmem:[%s703_s1 + $0x28] sm:$0xff]  }
   0x6   :  { %v535_v16 = vld [vmem:[%s703_s1 + $0x70] sm:$0xff]   ;;  %v21_v17 = vld [vmem:[%s704_s0] sm:$0xff]  ;;  %v543_v19 = vld [vmem:[%s703_s1 + $0x98] sm:$0xff]  }
   0x7   :  { %454 = vmatpush3.bf16.msra.mxu0 %v524_v4  ;;  %v419_v18 = vcombine.high %v21_v17, %v21_v17  ;;  %v536_v20 = vld [vmem:[%s703_s1 + $0x30] sm:$0xff]   ;;  %v538_v21 = vld [vmem:[%s703_s1 + $0x78] sm:$0xff]   ;;  %v542_v22 = vld [vmem:[%s704_s0 + $0x8] ss:$0 sps:$4 sm:$0xff]   ;;  %v418_v26 = vcombine.low %v21_v17, %v21_v17 }
   0x8   :  { %455 = vmatprep.subr.bf16.mxu0 %v525_v5  ;;  %490 = vmatpush3.bf16.msra.mxu1 %v534_v11  ;;  %v544_v23 = vld [vmem:[%s705_s3] sm:$0xff]   ;;  %v539_v24 = vld [vmem:[%s703_s1 + $0x38] sm:$0xff]   ;;  %v545_v25 = vld [vmem:[%s705_s3 + $0x8] sm:$0xff]  }
   0x9   :  { %491 = vmatprep.subr.bf16.mxu1 %v556_v1  ;;  %236 = vmatprep.mubr.bf16.mxu0 %v419_v18  ;;  %v546_v27 = vld [vmem:[%s705_s3 + $0x10] sm:$0xff]   ;;  %v547_v28 = vld [vmem:[%s705_s3 + $0x18] sm:$0xff]   ;;  %v548_v29 = vld [vmem:[%s705_s3 + $0x20] sm:$0xff]  }
   0xa   :  { %v549_v30 = vld [vmem:[%s705_s3 + $0x28] sm:$0xff]   ;;  %v550_v31 = vld [vmem:[%s705_s3 + $0x30] sm:$0xff]   ;;  %v551_v32 = vld [vmem:[%s705_s3 + $0x38] sm:$0xff]  }
   0xb   :  { %456 = vmatpush3.bf16.msra.mxu0 %v526_v6  ;;  %v417_v39 = vld [vmem:[%s706_s2] ss:$0 sm:$0xff] }
   0xc   :  { %457 = vmatprep.subr.bf16.mxu0 %v527_v7  ;;  %492 = vmatpush3.bf16.msra.mxu1 %v537_v14  ;;  %v442_v49 = vld [vmem:[%s707_s4] ss:$0 sm:$0xff] }
   0xd   :  { %493 = vmatprep.subr.bf16.mxu1 %v556_v1 }
   0xf   :  { %458 = vmatpush3.bf16.msra.mxu0 %v528_v9 }
  0x10   :  { %459 = vmatprep.subr.bf16.mxu0 %v529_v10  ;;  %494 = vmatpush3.bf16.msra.mxu1 %v543_v19 }
  0x11   :  { %499 = vmatprep.subr.bf16.mxu1 %v556_v1 }
  0x13   :  { %460 = vmatpush3.bf16.msra.mxu0 %v530_v12  ;;  %496 = vmatmul.mubr.msk.bf16.vlgmr.msra.gmra.mrb[0].mxu1 %vm200_vm1, %v542_v22 }
  0x14   :  { %461 = vmatprep.subr.bf16.mxu0 %v532_v13  ;;  %500 = vmatpush3.bf16.msra.mxu1 %v544_v23 }
  0x15   :  { %501 = vmatprep.subr.bf16.mxu1 %v556_v1  ;;  %515 = vmatprep.mubr.msk.bf16.mxu1 %vm557_vm0, %v556_v1 }
  0x17   :  { %462 = vmatpush3.bf16.msra.mxu0 %v533_v15 }
  0x18   :  { %463 = vmatprep.subr.bf16.mxu0 %v535_v16  ;;  %502 = vmatpush3.bf16.msra.mxu1 %v545_v25 }
  0x19   :  { %503 = vmatprep.subr.bf16.mxu1 %v556_v1 }
  0x1b   :  { %464 = vmatpush3.bf16.msra.mxu0 %v536_v20 }
  0x1c   :  { %465 = vmatprep.subr.bf16.mxu0 %v538_v21  ;;  %504 = vmatpush3.bf16.msra.mxu1 %v546_v27 }
  0x1d   :  { %505 = vmatprep.subr.bf16.mxu1 %v556_v1 }
  0x1f   :  { %466 = vmatpush3.bf16.msra.mxu0 %v539_v24 }
  0x20   :  { %506 = vmatpush3.bf16.msra.mxu1 %v547_v28 }
  0x21   :  { %507 = vmatprep.subr.bf16.mxu1 %v556_v1 }
  0x22   :  { %237 = vmatmul.mubr.bf16.vlgmr.msra.gmra.mrb[0].mxu0 %v418_v26 }
  0x24   :  { %508 = vmatpush3.bf16.msra.mxu1 %v548_v29 }
  0x25   :  { %509 = vmatprep.subr.bf16.mxu1 %v556_v1 }
  0x28   :  { %510 = vmatpush3.bf16.msra.mxu1 %v549_v30 }
  0x29   :  { %511 = vmatprep.subr.bf16.mxu1 %v556_v1 }
  0x2c   :  { %512 = vmatpush3.bf16.msra.mxu1 %v550_v31 }
  0x2d   :  { %513 = vmatprep.subr.bf16.mxu1 %v556_v1 }
  0x30   :  { %514 = vmatpush3.bf16.msra.mxu1 %v551_v32 }
  0xe6   :  { %v278_v33 = vpop.f32.mrb[0].mxu1 }
  0xe7   :  { %v497_v34 = vpop.f32.mrb[1].mxu1 }
  0xe8   :  { %v281_v35 = vpop.f32.mrb[2].mxu1 }
  0xe9   :  { %v498_v36 = vpop.f32.mrb[3].mxu1 }
  0xf5   :  { %v467_v37 = vpop.f32.mrb[0].mxu0 }
  0xf6   :  { %v468_v38 = vpop.f32.mrb[1].mxu0 }
  0xf7   :  { %v469_v40 = vadd.f32 %v468_v38, %v467_v37  ;;  %v470_v41 = vpop.f32.mrb[2].mxu0 }
  0xf8   :  { %v471_v42 = vpop.f32.mrb[3].mxu0 }
  0xf9   :  { %v239_v43 = vadd.f32 %v469_v40, %v417_v39 }
  0xfb   :  { %v279_v44 = vadd.f32 %v278_v33, %v239_v43 }
  0xfd   :  { %v284_v45 = vmax.f32 %v279_v44, 0.0 }
  0xff   :  { %v285_v46 = vpack.c.bf16 %v284_v45, %v284_v45 }
 0x101   :  { %516 = vmatmul.mubr.bf16.vlgmr.msra.gmra.mrb[4].mxu1 %v285_v46 }
 0x1d4   :  { %v391_v50 = vpop.f32.mrb[4].mxu1 }
 0x1d5   :  { %v392_v51 = vadd.f32 %v442_v49, %v391_v50  ;;  %v517_v52 = vpop.f32.mrb[5].mxu1 }
 0x1d6   :  { %v394_v53 = vpop.f32.mrb[6].mxu1 }
 0x1d7   :  { %v518_v54 = vpop.f32.mrb[7].mxu1  ;;  %v400_v55 = vsel %vm399_vm2, %v392_v51, -1e+30 }
 0x1d8   :  { %401 = vmax.xlane.f32.xlu0 %v400_v55 }
 0x265   :  { %v402_v56 = vpop.xlane.xlu0 %401 }
 0x266   :  { %v403_v57 = vsub.f32 %v400_v55, %v402_v56 }
 0x268   :  { %v404_v58 = vmul.f32 1.442695, %v403_v57 }
 0x26a   :  { %552 = vpow2.f32 %v404_v58 }
 0x274   :  { %v553_v59 = vpop.eup %552 }
 0x275   :  { %406 = vadd.xlane.f32.xlu0 %v553_v59 }
 0x302   :  { %v407_v60 = vpop.xlane.xlu0 %406 }
 0x303   :  { %554 = vlog2.f32 %v407_v60 }
 0x30d   :  { %v555_v61 = vpop.eup %554 }
 0x30e   :  { %v409_v62 = vmul.f32 0.6931472, %v555_v61 }
 0x310   :  { %v410_v63 = vadd.f32 %v409_v62, %v402_v56 }
 0x312   :  { %v411_v0 = vsub.f32 %v400_v55, %v410_v63 }
 0x314   :  { %412 = vst [vmem:[%s708_s5] sm:$0xff] %v411_v0 }

// kernel: cnn_forward.4
= control target key start
LH: loop header
LB: loop body
LE: loop exit
PB: predicated region body
PF: predicated region fallthrough
CT: control target
= control target key end

     0   :  { %vm164_vm0 = vcmask 998400   ;;  %vm171_vm1 = vcmask 1044480   ;;  %s916_s1 = inlined_call_operand.vmem [shape: bf16[250,128], index: 1, kind: input, shape index: {}]   ;;  %s917_s0 = inlined_call_operand.vmem [shape: bf16[4,32,250], index: 0, kind: input, shape index: {}]   ;;  %s918_s2 = inlined_call_operand.vmem [shape: f32[1,128], index: 2, kind: input, shape index: {}]   ;;  %s919_s3 = inlined_call_operand.vmem [shape: bf16[32,128], index: 3, kind: output, shape index: {}]  }
   0x1   :  { %v697_v0 = vld [vmem:[%s916_s1 + $0x40] sm:$0xff]   ;;  %v699_v2 = vld [vmem:[%s916_s1 + $0x48] sm:$0xff]   ;;  %v774_v4 = vld [vmem:[%s916_s1 + $0x50] sm:$0xff]  }
   0x2   :  { %v698_v1 = vld [vmem:[%s916_s1] sm:$0xff]   ;;  %581 = vmatprep.subr.bf16.mxu0 %v697_v0  ;;  %609 = vmatprep.subr.bf16.mxu1 %v697_v0  ;;  %v769_v3 = vld [vmem:[%s916_s1 + $0x8] sm:$0xff]   ;;  %v781_v5 = vld [vmem:[%s916_s1 + $0x10] sm:$0xff]  }
   0x3   :  { %582 = vmatpush3.bf16.msra.mxu0 %v698_v1  ;;  %610 = vmatpush3.bf16.msra.mxu1 %v698_v1  ;;  %v788_v6 = vld [vmem:[%s916_s1 + $0x58] sm:$0xff]   ;;  %v802_v8 = vld [vmem:[%s916_s1 + $0x60] sm:$0xff]   ;;  %v707_v10 = vld [vmem:[%s916_s1 + $0x68] sm:$0xff]  }
   0x4   :  { %583 = vmatprep.subr.bf16.mxu0 %v699_v2  ;;  %611 = vmatprep.subr.bf16.mxu1 %v699_v2  ;;  %v795_v7 = vld [vmem:[%s916_s1 + $0x18] sm:$0xff]   ;;  %v809_v9 = vld [vmem:[%s916_s1 + $0x20] sm:$0xff]   ;;  %v708_v13 = vld [vmem:[%s916_s1 + $0x28] sm:$0xff]  }
   0x5   :  { %v715_v11 = vld [vmem:[%s917_s0 + $0x4] ss:$8 sps:$4 sm:$0xff]   ;;  %v709_v14 = vld [vmem:[%s916_s1 + $0x70] sm:$0xff]   ;;  %v711_v16 = vld [vmem:[%s916_s1 + $0x78] sm:$0x1f]  }
   0x6   :  { %v718_v12 = vld [vmem:[%s917_s0 + $0x24] ss:$8 sps:$4 sm:$0xff]   ;;  %529 = vmatprep.mubr.msk.bf16.mxu0 %vm164_vm0, %v715_v11  ;;  %v710_v15 = vld [vmem:[%s916_s1 + $0x30] sm:$0xff]   ;;  %v712_v17 = vld [vmem:[%s916_s1 + $0x38] sm:$0xff]  }
   0x7   :  { %584 = vmatpush3.bf16.msra.mxu0 %v769_v3  ;;  %612 = vmatpush3.bf16.msra.mxu1 %v769_v3  ;;  %v713_v18 = vld [vmem:[%s917_s0] ss:$8 sps:$4 sm:$0xff]   ;;  %v719_v20 = vld [vmem:[%s917_s0 + $0x14] ss:$8 sps:$4 sm:$0xff]   ;;  %v723_v22 = vld [vmem:[%s917_s0 + $0x10] ss:$8 sps:$4 sm:$0xff]  }
   0x8   :  { %585 = vmatprep.subr.bf16.mxu0 %v774_v4  ;;  %613 = vmatprep.subr.bf16.mxu1 %v774_v4  ;;  %v716_v19 = vld [vmem:[%s917_s0 + $0x20] ss:$8 sps:$4 sm:$0xff]   ;;  %v721_v21 = vld [vmem:[%s917_s0 + $0x34] ss:$8 sps:$4 sm:$0xff]   ;;  %v724_v23 = vld [vmem:[%s917_s0 + $0x30] ss:$8 sps:$4 sm:$0xff]  }
   0x9   :  { %539 = vmatprep.mubr.msk.bf16.mxu1 %vm164_vm0, %v718_v12  ;;  %v727_v24 = vld [vmem:[%s917_s0 + $0x44] ss:$8 sps:$4 sm:$0xff]   ;;  %v725_v26 = vld [vmem:[%s917_s0 + $0x40] ss:$8 sps:$4 sm:$0xff]   ;;  %v731_v28 = vld [vmem:[%s917_s0 + $0x54] ss:$8 sps:$4 sm:$0xff]  }
   0xa   :  { %v730_v25 = vld [vmem:[%s917_s0 + $0x64] ss:$8 sps:$4 sm:$0xff]   ;;  %v728_v27 = vld [vmem:[%s917_s0 + $0x60] ss:$8 sps:$4 sm:$0xff]   ;;  %v733_v29 = vld [vmem:[%s917_s0 + $0x74] ss:$8 sps:$4 sm:$0xff]  }
   0xb   :  { %586 = vmatpush3.bf16.msra.mxu0 %v781_v5  ;;  %614 = vmatpush3.bf16.msra.mxu1 %v781_v5  ;;  %v735_v30 = vld [vmem:[%s917_s0 + $0x50] ss:$8 sps:$4 sm:$0xff]  }
   0xc   :  { %587 = vmatprep.subr.bf16.mxu0 %v788_v6  ;;  %615 = vmatprep.subr.bf16.mxu1 %v788_v6  ;;  %v736_v31 = vld [vmem:[%s917_s0 + $0x70] ss:$8 sps:$4 sm:$0xff]  }
   0xf   :  { %588 = vmatpush3.bf16.msra.mxu0 %v795_v7  ;;  %616 = vmatpush3.bf16.msra.mxu1 %v795_v7 }
  0x10   :  { %589 = vmatprep.subr.bf16.mxu0 %v802_v8  ;;  %617 = vmatprep.subr.bf16.mxu1 %v802_v8 }
  0x13   :  { %590 = vmatpush3.bf16.msra.mxu0 %v809_v9  ;;  %618 = vmatpush3.bf16.msra.mxu1 %v809_v9 }
  0x14   :  { %591 = vmatprep.subr.bf16.mxu0 %v707_v10  ;;  %619 = vmatprep.subr.bf16.mxu1 %v707_v10 }
  0x17   :  { %592 = vmatpush3.bf16.msra.mxu0 %v708_v13  ;;  %620 = vmatpush3.bf16.msra.mxu1 %v708_v13 }
  0x18   :  { %593 = vmatprep.subr.bf16.mxu0 %v709_v14  ;;  %621 = vmatprep.subr.bf16.mxu1 %v709_v14 }
  0x1b   :  { %594 = vmatpush3.bf16.msra.mxu0 %v710_v15  ;;  %622 = vmatpush3.bf16.msra.mxu1 %v710_v15 }
  0x1c   :  { %693 = vmatprep.subr.msk.bf16.mxu0 %vm171_vm1, %v711_v16  ;;  %694 = vmatprep.subr.msk.bf16.mxu1 %vm171_vm1, %v711_v16 }
  0x1f   :  { %596 = vmatpush3.bf16.msra.mxu0 %v712_v17  ;;  %624 = vmatpush3.bf16.msra.mxu1 %v712_v17 }
  0x20   :  { %637 = vmatprep.subr.bf16.mxu0 %v697_v0  ;;  %665 = vmatprep.subr.bf16.mxu1 %v697_v0 }
  0x22   :  { %208 = vmatmul.mubr.bf16.vlgmr.msra.gmra.mrb[0].mxu0 %v713_v18  ;;  %286 = vmatmul.mubr.bf16.vlgmr.msra.gmra.mrb[0].mxu1 %v716_v19 }
  0x23   :  { %638 = vmatpush3.bf16.msra.mxu0 %v698_v1  ;;  %666 = vmatpush3.bf16.msra.mxu1 %v698_v1 }
  0x24   :  { %639 = vmatprep.subr.bf16.mxu0 %v699_v2  ;;  %667 = vmatprep.subr.bf16.mxu1 %v699_v2 }
  0x25   :  { %530 = vmatprep.mubr.msk.bf16.mxu0 %vm164_vm0, %v719_v20  ;;  %540 = vmatprep.mubr.msk.bf16.mxu1 %vm164_vm0, %v721_v21 }
  0x27   :  { %640 = vmatpush3.bf16.msra.mxu0 %v769_v3  ;;  %668 = vmatpush3.bf16.msra.mxu1 %v769_v3 }
  0x28   :  { %641 = vmatprep.subr.bf16.mxu0 %v774_v4  ;;  %669 = vmatprep.subr.bf16.mxu1 %v774_v4 }
  0x2a   :  { %216 = vmatmul.mubr.bf16.gmra.mrb[4].mxu0 %v723_v22  ;;  %294 = vmatmul.mubr.bf16.gmra.mrb[4].mxu1 %v724_v23 }
  0x2b   :  { %642 = vmatpush3.bf16.msra.mxu0 %v781_v5  ;;  %670 = vmatpush3.bf16.msra.mxu1 %v781_v5 }
  0x2c   :  { %643 = vmatprep.subr.bf16.mxu0 %v788_v6  ;;  %671 = vmatprep.subr.bf16.mxu1 %v788_v6 }
  0x2d   :  { %549 = vmatprep.mubr.msk.bf16.mxu0 %vm164_vm0, %v727_v24  ;;  %559 = vmatprep.mubr.msk.bf16.mxu1 %vm164_vm0, %v730_v25 }
  0x2f   :  { %644 = vmatpush3.bf16.msra.mxu0 %v795_v7  ;;  %672 = vmatpush3.bf16.msra.mxu1 %v795_v7 }
  0x30   :  { %645 = vmatprep.subr.bf16.mxu0 %v802_v8  ;;  %673 = vmatprep.subr.bf16.mxu1 %v802_v8 }
  0x33   :  { %646 = vmatpush3.bf16.msra.mxu0 %v809_v9  ;;  %674 = vmatpush3.bf16.msra.mxu1 %v809_v9  ;;  %v561_v9 = vld [vmem:[%s918_s2] ss:$0 sm:$0xff] }
  0x34   :  { %647 = vmatprep.subr.bf16.mxu0 %v707_v10  ;;  %675 = vmatprep.subr.bf16.mxu1 %v707_v10 }
  0x37   :  { %648 = vmatpush3.bf16.msra.mxu0 %v708_v13  ;;  %676 = vmatpush3.bf16.msra.mxu1 %v708_v13 }
  0x38   :  { %649 = vmatprep.subr.bf16.mxu0 %v709_v14  ;;  %677 = vmatprep.subr.bf16.mxu1 %v709_v14 }
  0x3b   :  { %650 = vmatpush3.bf16.msra.mxu0 %v710_v15  ;;  %678 = vmatpush3.bf16.msra.mxu1 %v710_v15 }
  0x3c   :  { %695 = vmatprep.subr.msk.bf16.mxu0 %vm171_vm1, %v711_v16  ;;  %696 = vmatprep.subr.msk.bf16.mxu1 %vm171_vm1, %v711_v16 }
  0x3f   :  { %652 = vmatpush3.bf16.msra.mxu0 %v712_v17  ;;  %680 = vmatpush3.bf16.msra.mxu1 %v712_v17 }
  0x42   :  { %368 = vmatmul.mubr.bf16.vlgmr.msra.gmra.mrb[8].mxu0 %v725_v26  ;;  %450 = vmatmul.mubr.bf16.vlgmr.msra.gmra.mrb[8].mxu1 %v728_v27 }
  0x43   :  { %550 = vmatprep.mubr.msk.bf16.mxu0 %vm164_vm0, %v731_v28  ;;  %560 = vmatprep.mubr.msk.bf16.mxu1 %vm164_vm0, %v733_v29 }
  0x4a   :  { %376 = vmatmul.mubr.bf16.gmra.mrb[12].mxu0 %v735_v30  ;;  %458 = vmatmul.mubr.bf16.gmra.mrb[12].mxu1 %v736_v31 }
  0xf5   :  { %v597_v32 = vpop.f32.mrb[0].mxu0  ;;  %v625_v33 = vpop.f32.mrb[0].mxu1 }
  0xf6   :  { %v598_v34 = vpop.f32.mrb[1].mxu0  ;;  %v626_v35 = vpop.f32.mrb[1].mxu1 }
  0xf7   :  { %v599_v36 = vadd.f32 %v598_v34, %v597_v32  ;;  %v627_v37 = vadd.f32 %v626_v35, %v625_v33  ;;  %v600_v38 = vpop.f32.mrb[2].mxu0  ;;  %v628_v39 = vpop.f32.mrb[2].mxu1 }
  0xf8   :  { %v601_v40 = vpop.f32.mrb[3].mxu0  ;;  %v629_v41 = vpop.f32.mrb[3].mxu1 }
  0xf9   :  { %v302_v42 = vmax.f32 %v599_v36, %v627_v37  ;;  %v602_v43 = vadd.f32 %v601_v40, %v600_v38  ;;  %v630_v44 = vadd.f32 %v629_v41, %v628_v39 }
  0xfb   :  { %v303_v45 = vmax.f32 %v602_v43, %v630_v44 }
  0xfd   :  { %v603_v46 = vpop.f32.mrb[4].mxu0  ;;  %v631_v47 = vpop.f32.mrb[4].mxu1 }
  0xfe   :  { %v604_v48 = vpop.f32.mrb[5].mxu0  ;;  %v632_v49 = vpop.f32.mrb[5].mxu1 }
  0xff   :  { %v605_v50 = vadd.f32 %v604_v48, %v603_v46  ;;  %v633_v51 = vadd.f32 %v632_v49, %v631_v47  ;;  %v606_v52 = vpop.f32.mrb[6].mxu0  ;;  %v634_v53 = vpop.f32.mrb[6].mxu1 }
 0x100   :  { %v607_v54 = vpop.f32.mrb[7].mxu0  ;;  %v635_v55 = vpop.f32.mrb[7].mxu1 }
 0x101   :  { %v304_v56 = vmax.f32 %v605_v50, %v633_v51  ;;  %v608_v57 = vadd.f32 %v607_v54, %v606_v52  ;;  %v636_v58 = vadd.f32 %v635_v55, %v634_v53 }
 0x103   :  { %v305_v59 = vmax.f32 %v608_v57, %v636_v58 }
 0x115   :  { %v653_v60 = vpop.f32.mrb[8].mxu0  ;;  %v681_v61 = vpop.f32.mrb[8].mxu1 }
 0x116   :  { %v654_v62 = vpop.f32.mrb[9].mxu0  ;;  %v682_v63 = vpop.f32.mrb[9].mxu1 }
 0x117   :  { %v655_v0 = vadd.f32 %v654_v62, %v653_v60  ;;  %v683_v1 = vadd.f32 %v682_v63, %v681_v61  ;;  %v656_v2 = vpop.f32.mrb[10].mxu0  ;;  %v684_v3 = vpop.f32.mrb[10].mxu1 }
 0x118   :  { %v657_v4 = vpop.f32.mrb[11].mxu0  ;;  %v685_v5 = vpop.f32.mrb[11].mxu1 }
 0x119   :  { %v384_v6 = vmax.f32 %v302_v42, %v655_v0  ;;  %v658_v7 = vadd.f32 %v657_v4, %v656_v2  ;;  %v686_v8 = vadd.f32 %v685_v5, %v684_v3 }
 0x11b   :  { %v466_v10 = vmax.f32 %v384_v6, %v683_v1  ;;  %v385_v11 = vmax.f32 %v303_v45, %v658_v7 }
 0x11d   :  { %v477_v12 = vadd.f32 %v561_v9, %v466_v10  ;;  %v467_v13 = vmax.f32 %v385_v11, %v686_v8  ;;  %v659_v14 = vpop.f32.mrb[12].mxu0  ;;  %v687_v15 = vpop.f32.mrb[12].mxu1 }
 0x11e   :  { %v660_v16 = vpop.f32.mrb[13].mxu0  ;;  %v688_v17 = vpop.f32.mrb[13].mxu1 }
 0x11f   :  { %v478_v18 = vadd.f32 %v561_v9, %v467_v13  ;;  %v661_v19 = vadd.f32 %v660_v16, %v659_v14  ;;  %v689_v20 = vadd.f32 %v688_v17, %v687_v15  ;;  %v662_v21 = vpop.f32.mrb[14].mxu0  ;;  %v690_v22 = vpop.f32.mrb[14].mxu1  ;;  %v481_v23 = vmax.f32 %v477_v12, 0.0 }
 0x120   :  { %v663_v24 = vpop.f32.mrb[15].mxu0  ;;  %v691_v25 = vpop.f32.mrb[15].mxu1 }
 0x121   :  { %v482_v26 = vmax.f32 %v478_v18, 0.0  ;;  %v386_v27 = vmax.f32 %v304_v56, %v661_v19  ;;  %v664_v28 = vadd.f32 %v663_v24, %v662_v21  ;;  %v692_v29 = vadd.f32 %v691_v25, %v690_v22 }
 0x123   :  { %v573_v30 = vpack.c.bf16 %v482_v26, %v481_v23  ;;  %v468_v31 = vmax.f32 %v386_v27, %v689_v20  ;;  %v387_v32 = vmax.f32 %v305_v59, %v664_v28 }
 0x125   :  { %574 = vst [vmem:[%s919_s3] sm:$0xff] %v573_v30   ;;  %v479_v33 = vadd.f32 %v561_v9, %v468_v31  ;;  %v469_v34 = vmax.f32 %v387_v32, %v692_v29 }
 0x127   :  { %v480_v35 = vadd.f32 %v561_v9, %v469_v34  ;;  %v483_v36 = vmax.f32 %v479_v33, 0.0 }
 0x129   :  { %v484_v37 = vmax.f32 %v480_v35, 0.0 }
 0x12b   :  { %v578_v38 = vpack.c.bf16 %v484_v37, %v483_v36 }
 0x12d   :  { %580 = vst [vmem:[%s919_s3 + $0x8] sm:$0xff] %v578_v38  }

</bundles_post_ra>
